<compile_context>
chip_gen: v5e
topology: v5e:2x2
jax: 0.10.0
libtpu: 0.0.40
codegen_flags: <defaults>
</compile_context>

<pallas_src>
import jax
import jax.numpy as jnp
from jax.experimental import pallas as pl
from jax.experimental.pallas import tpu as pltpu


def _round_up(v, m):
    return ((v + m - 1) // m) * m


def _device_profile():
    """-> (num_tensorcores, target VMEM limit bytes) for the current TPU generation."""
    try:
        kind = jax.devices()[0].device_kind.lower()
    except Exception:
        kind = ""
    if "v7" in kind:
        return 2, 48 << 20     # v7x: 64 MiB physical VMEM / TC, 2 TCs per chip
    return 1, 100 << 20        # v5e / v5p / v6e: 128 MiB physical VMEM, 1 TC per chip


def _choose_tb(B, N, padded_dims, compute_dtype, *, act_budget_bytes, num_cores):
    """Largest batch block that divides B, keeps block dims layout-legal (multiple of
    8 or the full batch), fits a rough activation footprint in the budget, and (only
    on multi-TC chips) leaves >= num_cores grid blocks for megacore sharding."""
    bpe_c = jnp.dtype(compute_dtype).itemsize
    n_in_p, n_out_p = padded_dims[0], padded_dims[-1]
    max_w = max(padded_dims)

    def footprint(tb):
        m = tb * N
        x_b = 2 * m * n_in_p * bpe_c          # double-buffered streaming input
        mask_b = 2 * tb * max(N, 128) * 4
        act_b = 2 * m * max_w * 4             # ~two live f32 intermediates
        out_b = 2 * tb * n_out_p * 4
        return x_b + mask_b + act_b + out_b

    divisors = [d for d in range(B, 0, -1) if B % d == 0]
    cands = [d for d in divisors if d % 8 == 0] or [B]
    fitting = [d for d in cands if footprint(d) <= act_budget_bytes] or [cands[-1]]
    if num_cores >= 2:
        multi = [d for d in fitting if B // d >= num_cores]
        if multi:
            return multi[0]
    return fitting[0]


def _make_kernel(num_linear, tb, n, compute_dtype):
    def kernel(x_ref, mask_ref, *rest):
        # rest = (w0, b0, w1, b1, ..., w_{L-1}, b_{L-1}, out_ref)
        params = rest[: 2 * num_linear]
        out_ref = rest[2 * num_linear]

        # x_ref is pre-flattened (tb*N, n_in_pad) and already in compute_dtype.
        h = x_ref[...]

        # Hidden layers: one big MXU matmul each (M = tb*N), bias + ReLU in f32.
        for li in range(num_linear - 1):
            w = params[2 * li][...]                       # (d_in_pad, d_out_pad), compute_dtype
            b = params[2 * li + 1][...]                   # (1, d_out_pad), f32
            z = jnp.dot(h.astype(compute_dtype), w,
                        preferred_element_type=jnp.float32) + b
            h = jnp.maximum(z, 0.0)                       # f32 VPU (v5e-safe)

        # Masked mean pool BEFORE the final linear layer (exact because the last
        # layer has no ReLU and sum_n mask_scaled_n == 1).  mask is pre-scaled by 1/L.
        f = h.shape[-1]
        h3 = h.reshape(tb, n, f)                          # sublane split; free when N % 8 == 0
        pooled = jnp.sum(h3 * mask_ref[...][:, :, None], axis=1)      # (tb, f), f32

        w_last = params[2 * (num_linear - 1)][...]
        b_last = params[2 * (num_linear - 1) + 1][...]
        out = jnp.dot(pooled.astype(compute_dtype), w_last,
                      preferred_element_type=jnp.float32) + b_last    # M = tb only
        out_ref[...] = out.astype(out_ref.dtype)

    return kernel


def mlp_encoder(x, mask, weights, biases, *, tb=None,
                compute_dtype=jnp.bfloat16, lane_pad=128):
    """x: (B, N, n_in), mask: (B, N), weights[i]: (d_in, d_out), biases[i]: (1, d_out).

    compute_dtype affects matmul operands only; accumulation and elementwise work
    stay f32.  Pass jnp.float32 for reference-tight numerics; bf16 is the fast MXU
    path on v5e/v6e/v7x.  Use lane_pad=256 to match the v6e/v7x MXU tile exactly.
    """
    B, N, n_in = x.shape
    num_linear = len(weights)
    n_out = weights[-1].shape[1]

    # Host-side zero padding of every feature dim to a lane multiple (exact).
    dims = [n_in] + [w.shape[1] for w in weights]
    pdims = [_round_up(d, lane_pad) for d in dims]
    w_p, b_p = [], []
    for li, (w, b) in enumerate(zip(weights, biases)):
        w_p.append(jnp.pad(w, ((0, pdims[li] - dims[li]),
                               (0, pdims[li + 1] - dims[li + 1]))).astype(compute_dtype))
        b_p.append(jnp.pad(b, ((0, 0), (0, pdims[li + 1] - dims[li + 1]))).astype(jnp.float32))
    n_in_pad, n_out_pad = pdims[0], pdims[-1]

    # Flatten X on the host (free layout change, keeps M = TB*N sublane-aligned for
    # any N) and cast once to compute_dtype.
    x_p = jnp.pad(x, ((0, 0), (0, 0), (0, n_in_pad - n_in))) if n_in_pad != n_in else x
    x_flat = x_p.reshape(B * N, n_in_pad).astype(compute_dtype)

    # Fold 1/length into the mask (no lane-width-1 input, no in-kernel divide).
    mask_f = mask.astype(jnp.float32)
    mask_scaled = mask_f / mask_f.sum(axis=1, keepdims=True)          # (B, N); 0-len -> NaN

    # Generation- and weight-aware tiling / VMEM budget.
    num_cores, vmem_target = _device_profile()
    weight_bytes = sum(int(w.size) * w.dtype.itemsize for w in w_p) \
                 + sum(int(b.size) * 4 for b in b_p)                  # single-buffered weights
    if tb is None:
        tb = _choose_tb(B, N, pdims, compute_dtype,
                        act_budget_bytes=max(vmem_target - weight_bytes, 4 << 20),
                        num_cores=num_cores)
    assert B % tb == 0, (B, tb)

    kernel = _make_kernel(num_linear, tb, N, compute_dtype)
    args = [x_flat, mask_scaled]
    for w, b in zip(w_p, b_p):
        args += [w, b]

    def run(single_buffer_weights):
        in_specs = [
            # Streaming X block (raise to pl.Buffered(3) here if xprof shows DMA
            # waits on v5e's lower HBM bandwidth).
            pl.BlockSpec((tb * N, n_in_pad), lambda i: (i, 0)),
            pl.BlockSpec((tb, N), lambda i: (i, 0)),                  # scaled mask
        ]
        wkw = dict(pipeline_mode=pl.Buffered(1)) if single_buffer_weights else {}
        for w, b in zip(w_p, b_p):
            # Constant index_map: resident across the grid; Buffered(1) avoids
            # double-buffering VMEM for data that never changes.
            in_specs.append(pl.BlockSpec(w.shape, lambda i: (0, 0), **wkw))
            in_specs.append(pl.BlockSpec(b.shape, lambda i: (0, 0), **wkw))
        return pl.pallas_call(
            kernel,
            out_shape=jax.ShapeDtypeStruct((B, n_out_pad), jnp.float32),
            grid=(B // tb,),
            in_specs=in_specs,
            out_specs=pl.BlockSpec((tb, n_out_pad), lambda i: (i, 0)),
            compiler_params=pltpu.CompilerParams(
                dimension_semantics=("parallel",),
                vmem_limit_bytes=int(vmem_target)),
        )(*args)

    try:
        out_padded = run(True)
    except Exception:
        # This jax/libtpu build rejected pipeline_mode=pl.Buffered(1): fall back to
        # default (double-buffered) weight blocks — identical numerics, more VMEM.
        out_padded = run(False)
    return out_padded[:, :n_out]


def init_params(key, n_in, n_hidden, n_out, num_layers):
    """Deterministic synthetic init. Returns (weights, biases); weights are (d_in, d_out)."""
    dims = [n_in] + [n_hidden] * num_layers + [n_out]
    weights, biases = [], []
    for i in range(len(dims) - 1):
        key, kw, kb = jax.random.split(key, 3)
        scale = 1.0 / jnp.sqrt(dims[i])
        weights.append(jax.random.uniform(kw, (dims[i], dims[i + 1]),
                                          minval=-scale, maxval=scale, dtype=jnp.float32))
        biases.append(jax.random.uniform(kb, (1, dims[i + 1]),
                                         minval=-scale, maxval=scale, dtype=jnp.float32))
    return weights, biases


def reference(x, mask, weights, biases):
    h = x
    for i, (w, b) in enumerate(zip(weights, biases)):
        h = jnp.einsum("bnd,de->bne", h, w, precision=jax.lax.Precision.HIGHEST) + b[0]
        if i < len(weights) - 1:
            h = jnp.maximum(h, 0.0)
    lengths = mask.sum(axis=1)                                    # (B,)
    return (h * mask[:, :, None]).sum(axis=1) / lengths[:, None]  # (B, n_out)


if __name__ == "__main__":
    B, N = 16, 8
    n_in, n_hidden, n_out, num_layers = 16, 32, 16, 2

    key = jax.random.PRNGKey(0)
    kx, kp = jax.random.split(key, 2)

    x = jax.random.normal(kx, (B, N, n_in), dtype=jnp.float32)
    # Binary mask with a different valid length (>=1) per example.
    valid = (jnp.arange(B, dtype=jnp.int32) % N) + 1
    mask = (jnp.arange(N)[None, :] < valid[:, None]).astype(jnp.float32)

    weights, biases = init_params(kp, n_in, n_hidden, n_out, num_layers)
    ref = reference(x, mask, weights, biases)

    # Full-precision path: must match the reference tightly.
    out_f32 = jax.block_until_ready(
        mlp_encoder(x, mask, weights, biases, compute_dtype=jnp.float32))
    assert out_f32.shape == (B, n_out), out_f32.shape
    err32 = float(jnp.max(jnp.abs(out_f32 - ref)))
    assert jnp.allclose(out_f32, ref, atol=1e-4, rtol=1e-4), err32

    # bf16 MXU path (recommended fast path on v5e/v6e/v7x): loose tolerance.
    out_bf16 = jax.block_until_ready(
        mlp_encoder(x, mask, weights, biases, compute_dtype=jnp.bfloat16))
    err16 = float(jnp.max(jnp.abs(out_bf16 - ref)))
    assert jnp.allclose(out_bf16, ref, atol=1e-1, rtol=1e-1), err16

    print("KERNEL_OK")
</pallas_src>

<mosaic_0001>
module attributes {stable_mosaic.version = 11 : i64} {
  func.func @kernel(%arg0: i32, %arg1: memref<128x128xf32, #tpu.memory_space<vmem>>, %arg2: memref<16x8xf32, #tpu.memory_space<vmem>>, %arg3: memref<128x128xf32, #tpu.memory_space<vmem>>, %arg4: memref<1x128xf32, #tpu.memory_space<vmem>>, %arg5: memref<128x128xf32, #tpu.memory_space<vmem>>, %arg6: memref<1x128xf32, #tpu.memory_space<vmem>>, %arg7: memref<128x128xf32, #tpu.memory_space<vmem>>, %arg8: memref<1x128xf32, #tpu.memory_space<vmem>>, %arg9: memref<16x128xf32, #tpu.memory_space<vmem>>) attributes {dimension_semantics = [#tpu.dimension_semantics<parallel>], iteration_bounds = array<i64: 1>, scalar_prefetch = 0 : i64, scratch_operands = 0 : i64, tpu.core_type = #tpu.core_type<tc>, window_params = [{transform_indices = @transform_0, window_bounds = array<i64: 128, 128>}, {transform_indices = @transform_1, window_bounds = array<i64: 16, 8>}, {pipeline_mode = #tpu.pipeline_mode<synchronous>, transform_indices = @transform_2, window_bounds = array<i64: 128, 128>}, {pipeline_mode = #tpu.pipeline_mode<synchronous>, transform_indices = @transform_3, window_bounds = array<i64: 1, 128>}, {pipeline_mode = #tpu.pipeline_mode<synchronous>, transform_indices = @transform_4, window_bounds = array<i64: 128, 128>}, {pipeline_mode = #tpu.pipeline_mode<synchronous>, transform_indices = @transform_5, window_bounds = array<i64: 1, 128>}, {pipeline_mode = #tpu.pipeline_mode<synchronous>, transform_indices = @transform_6, window_bounds = array<i64: 128, 128>}, {pipeline_mode = #tpu.pipeline_mode<synchronous>, transform_indices = @transform_7, window_bounds = array<i64: 1, 128>}, {transform_indices = @transform_8, window_bounds = array<i64: 16, 128>}]} {
    %c0 = arith.constant 0 : index
    %c0_0 = arith.constant 0 : index
    %0 = vector.load %arg1[%c0, %c0_0] : memref<128x128xf32, #tpu.memory_space<vmem>>, vector<128x128xf32>
    %c0_1 = arith.constant 0 : index
    %c0_2 = arith.constant 0 : index
    %1 = vector.load %arg3[%c0_1, %c0_2] : memref<128x128xf32, #tpu.memory_space<vmem>>, vector<128x128xf32>
    %c0_3 = arith.constant 0 : index
    %c0_4 = arith.constant 0 : index
    %2 = vector.load %arg4[%c0_3, %c0_4] : memref<1x128xf32, #tpu.memory_space<vmem>>, vector<1x128xf32>
    %cst = arith.constant dense<0.000000e+00> : vector<128x128xf32>
    %3 = tpu.matmul %0, %1, %cst {dimension_numbers = #tpu.dot_dimension_numbers<[1], [0], [0], [1], [0, 0, 1, 1], [], []>} : vector<128x128xf32>, vector<128x128xf32>, vector<128x128xf32> -> vector<128x128xf32>
    %4 = vector.broadcast %2 : vector<1x128xf32> to vector<128x128xf32>
    %5 = arith.addf %3, %4 : vector<128x128xf32>
    %cst_5 = arith.constant 0.000000e+00 : f32
    %6 = vector.broadcast %cst_5 : f32 to vector<128x128xf32>
    %7 = arith.maximumf %5, %6 : vector<128x128xf32>
    %c0_6 = arith.constant 0 : index
    %c0_7 = arith.constant 0 : index
    %8 = vector.load %arg5[%c0_6, %c0_7] : memref<128x128xf32, #tpu.memory_space<vmem>>, vector<128x128xf32>
    %c0_8 = arith.constant 0 : index
    %c0_9 = arith.constant 0 : index
    %9 = vector.load %arg6[%c0_8, %c0_9] : memref<1x128xf32, #tpu.memory_space<vmem>>, vector<1x128xf32>
    %cst_10 = arith.constant dense<0.000000e+00> : vector<128x128xf32>
    %10 = tpu.matmul %7, %8, %cst_10 {dimension_numbers = #tpu.dot_dimension_numbers<[1], [0], [0], [1], [0, 0, 1, 1], [], []>} : vector<128x128xf32>, vector<128x128xf32>, vector<128x128xf32> -> vector<128x128xf32>
    %11 = vector.broadcast %9 : vector<1x128xf32> to vector<128x128xf32>
    %12 = arith.addf %10, %11 : vector<128x128xf32>
    %cst_11 = arith.constant 0.000000e+00 : f32
    %13 = vector.broadcast %cst_11 : f32 to vector<128x128xf32>
    %14 = arith.maximumf %12, %13 : vector<128x128xf32>
    %15 = vector.shape_cast %14 : vector<128x128xf32> to vector<16x8x128xf32>
    %c0_12 = arith.constant 0 : index
    %c0_13 = arith.constant 0 : index
    %16 = vector.load %arg2[%c0_12, %c0_13] : memref<16x8xf32, #tpu.memory_space<vmem>>, vector<16x8xf32>
    %17 = vector.shape_cast %16 : vector<16x8xf32> to vector<16x8x1xf32>
    %18 = vector.broadcast %17 : vector<16x8x1xf32> to vector<16x8x128xf32>
    %19 = arith.mulf %15, %18 : vector<16x8x128xf32>
    %cst_14 = arith.constant dense<0.000000e+00> : vector<16x128xf32>
    %20 = vector.multi_reduction <add>, %19, %cst_14 [1] : vector<16x8x128xf32> to vector<16x128xf32>
    %c0_15 = arith.constant 0 : index
    %c0_16 = arith.constant 0 : index
    %21 = vector.load %arg7[%c0_15, %c0_16] : memref<128x128xf32, #tpu.memory_space<vmem>>, vector<128x128xf32>
    %c0_17 = arith.constant 0 : index
    %c0_18 = arith.constant 0 : index
    %22 = vector.load %arg8[%c0_17, %c0_18] : memref<1x128xf32, #tpu.memory_space<vmem>>, vector<1x128xf32>
    %cst_19 = arith.constant dense<0.000000e+00> : vector<16x128xf32>
    %23 = tpu.matmul %20, %21, %cst_19 {dimension_numbers = #tpu.dot_dimension_numbers<[1], [0], [0], [1], [0, 0, 1, 1], [], []>} : vector<16x128xf32>, vector<128x128xf32>, vector<16x128xf32> -> vector<16x128xf32>
    %24 = vector.broadcast %22 : vector<1x128xf32> to vector<16x128xf32>
    %25 = arith.addf %23, %24 : vector<16x128xf32>
    %c0_20 = arith.constant 0 : index
    %c0_21 = arith.constant 0 : index
    %26 = vector.load %arg9[%c0_20, %c0_21] : memref<16x128xf32, #tpu.memory_space<vmem>>, vector<16x128xf32>
    tpu.vector_store %arg9[%c0_20, %c0_21], %25 {strides = array<i32>} : memref<16x128xf32, #tpu.memory_space<vmem>>, vector<16x128xf32>,
    return
  }
  func.func @transform_0(%arg0: i32) -> (i32, i32) {
    %c0_i32 = arith.constant 0 : i32
    %c0_i32_0 = arith.constant 0 : i32
    return %arg0, %c0_i32 : i32, i32
  }
  func.func @transform_1(%arg0: i32) -> (i32, i32) {
    %c0_i32 = arith.constant 0 : i32
    %c0_i32_0 = arith.constant 0 : i32
    return %arg0, %c0_i32 : i32, i32
  }
  func.func @transform_2(%arg0: i32) -> (i32, i32) {
    %c0_i32 = arith.constant 0 : i32
    %c0_i32_0 = arith.constant 0 : i32
    %c0_i32_1 = arith.constant 0 : i32
    return %c0_i32, %c0_i32_0 : i32, i32
  }
  func.func @transform_3(%arg0: i32) -> (i32, i32) {
    %c0_i32 = arith.constant 0 : i32
    %c0_i32_0 = arith.constant 0 : i32
    %c0_i32_1 = arith.constant 0 : i32
    return %c0_i32, %c0_i32_0 : i32, i32
  }
  func.func @transform_4(%arg0: i32) -> (i32, i32) {
    %c0_i32 = arith.constant 0 : i32
    %c0_i32_0 = arith.constant 0 : i32
    %c0_i32_1 = arith.constant 0 : i32
    return %c0_i32, %c0_i32_0 : i32, i32
  }
  func.func @transform_5(%arg0: i32) -> (i32, i32) {
    %c0_i32 = arith.constant 0 : i32
    %c0_i32_0 = arith.constant 0 : i32
    %c0_i32_1 = arith.constant 0 : i32
    return %c0_i32, %c0_i32_0 : i32, i32
  }
  func.func @transform_6(%arg0: i32) -> (i32, i32) {
    %c0_i32 = arith.constant 0 : i32
    %c0_i32_0 = arith.constant 0 : i32
    %c0_i32_1 = arith.constant 0 : i32
    return %c0_i32, %c0_i32_0 : i32, i32
  }
  func.func @transform_7(%arg0: i32) -> (i32, i32) {
    %c0_i32 = arith.constant 0 : i32
    %c0_i32_0 = arith.constant 0 : i32
    %c0_i32_1 = arith.constant 0 : i32
    return %c0_i32, %c0_i32_0 : i32, i32
  }
  func.func @transform_8(%arg0: i32) -> (i32, i32) {
    %c0_i32 = arith.constant 0 : i32
    %c0_i32_0 = arith.constant 0 : i32
    return %arg0, %c0_i32 : i32, i32
  }
}

module attributes {stable_mosaic.version = 11 : i64} {
  func.func @kernel(%arg0: i32, %arg1: memref<128x128xf32, #tpu.memory_space<vmem>>, %arg2: memref<16x8xf32, #tpu.memory_space<vmem>>, %arg3: memref<128x128xf32, #tpu.memory_space<vmem>>, %arg4: memref<1x128xf32, #tpu.memory_space<vmem>>, %arg5: memref<128x128xf32, #tpu.memory_space<vmem>>, %arg6: memref<1x128xf32, #tpu.memory_space<vmem>>, %arg7: memref<128x128xf32, #tpu.memory_space<vmem>>, %arg8: memref<1x128xf32, #tpu.memory_space<vmem>>, %arg9: memref<16x128xf32, #tpu.memory_space<vmem>>) attributes {dimension_semantics = [#tpu.dimension_semantics<parallel>], iteration_bounds = array<i64: 1>, scalar_prefetch = 0 : i64, scratch_operands = 0 : i64, tpu.core_type = #tpu.core_type<tc>, window_params = [{transform_indices = @transform_0, window_bounds = array<i64: 128, 128>}, {transform_indices = @transform_1, window_bounds = array<i64: 16, 8>}, {pipeline_mode = #tpu.pipeline_mode<synchronous>, transform_indices = @transform_2, window_bounds = array<i64: 128, 128>}, {pipeline_mode = #tpu.pipeline_mode<synchronous>, transform_indices = @transform_3, window_bounds = array<i64: 1, 128>}, {pipeline_mode = #tpu.pipeline_mode<synchronous>, transform_indices = @transform_4, window_bounds = array<i64: 128, 128>}, {pipeline_mode = #tpu.pipeline_mode<synchronous>, transform_indices = @transform_5, window_bounds = array<i64: 1, 128>}, {pipeline_mode = #tpu.pipeline_mode<synchronous>, transform_indices = @transform_6, window_bounds = array<i64: 128, 128>}, {pipeline_mode = #tpu.pipeline_mode<synchronous>, transform_indices = @transform_7, window_bounds = array<i64: 1, 128>}, {transform_indices = @transform_8, window_bounds = array<i64: 16, 128>}]} {
    %c0 = arith.constant 0 : index
    %c0_0 = arith.constant 0 : index
    %0 = vector.load %arg1[%c0, %c0_0] : memref<128x128xf32, #tpu.memory_space<vmem>>, vector<128x128xf32>
    %c0_1 = arith.constant 0 : index
    %c0_2 = arith.constant 0 : index
    %1 = vector.load %arg3[%c0_1, %c0_2] : memref<128x128xf32, #tpu.memory_space<vmem>>, vector<128x128xf32>
    %c0_3 = arith.constant 0 : index
    %c0_4 = arith.constant 0 : index
    %2 = vector.load %arg4[%c0_3, %c0_4] : memref<1x128xf32, #tpu.memory_space<vmem>>, vector<1x128xf32>
    %cst = arith.constant dense<0.000000e+00> : vector<128x128xf32>
    %3 = tpu.matmul %0, %1, %cst {dimension_numbers = #tpu.dot_dimension_numbers<[1], [0], [0], [1], [0, 0, 1, 1], [], []>} : vector<128x128xf32>, vector<128x128xf32>, vector<128x128xf32> -> vector<128x128xf32>
    %4 = vector.broadcast %2 : vector<1x128xf32> to vector<128x128xf32>
    %5 = arith.addf %3, %4 : vector<128x128xf32>
    %cst_5 = arith.constant 0.000000e+00 : f32
    %6 = vector.broadcast %cst_5 : f32 to vector<128x128xf32>
    %7 = arith.maximumf %5, %6 : vector<128x128xf32>
    %c0_6 = arith.constant 0 : index
    %c0_7 = arith.constant 0 : index
    %8 = vector.load %arg5[%c0_6, %c0_7] : memref<128x128xf32, #tpu.memory_space<vmem>>, vector<128x128xf32>
    %c0_8 = arith.constant 0 : index
    %c0_9 = arith.constant 0 : index
    %9 = vector.load %arg6[%c0_8, %c0_9] : memref<1x128xf32, #tpu.memory_space<vmem>>, vector<1x128xf32>
    %cst_10 = arith.constant dense<0.000000e+00> : vector<128x128xf32>
    %10 = tpu.matmul %7, %8, %cst_10 {dimension_numbers = #tpu.dot_dimension_numbers<[1], [0], [0], [1], [0, 0, 1, 1], [], []>} : vector<128x128xf32>, vector<128x128xf32>, vector<128x128xf32> -> vector<128x128xf32>
    %11 = vector.broadcast %9 : vector<1x128xf32> to vector<128x128xf32>
    %12 = arith.addf %10, %11 : vector<128x128xf32>
    %cst_11 = arith.constant 0.000000e+00 : f32
    %13 = vector.broadcast %cst_11 : f32 to vector<128x128xf32>
    %14 = arith.maximumf %12, %13 : vector<128x128xf32>
    %15 = vector.shape_cast %14 : vector<128x128xf32> to vector<16x8x128xf32>
    %c0_12 = arith.constant 0 : index
    %c0_13 = arith.constant 0 : index
    %16 = vector.load %arg2[%c0_12, %c0_13] : memref<16x8xf32, #tpu.memory_space<vmem>>, vector<16x8xf32>
    %17 = vector.shape_cast %16 : vector<16x8xf32> to vector<16x8x1xf32>
    %18 = vector.broadcast %17 : vector<16x8x1xf32> to vector<16x8x128xf32>
    %19 = arith.mulf %15, %18 : vector<16x8x128xf32>
    %cst_14 = arith.constant dense<0.000000e+00> : vector<16x128xf32>
    %20 = vector.multi_reduction <add>, %19, %cst_14 [1] : vector<16x8x128xf32> to vector<16x128xf32>
    %c0_15 = arith.constant 0 : index
    %c0_16 = arith.constant 0 : index
    %21 = vector.load %arg7[%c0_15, %c0_16] : memref<128x128xf32, #tpu.memory_space<vmem>>, vector<128x128xf32>
    %c0_17 = arith.constant 0 : index
    %c0_18 = arith.constant 0 : index
    %22 = vector.load %arg8[%c0_17, %c0_18] : memref<1x128xf32, #tpu.memory_space<vmem>>, vector<1x128xf32>
    %cst_19 = arith.constant dense<0.000000e+00> : vector<16x128xf32>
    %23 = tpu.matmul %20, %21, %cst_19 {dimension_numbers = #tpu.dot_dimension_numbers<[1], [0], [0], [1], [0, 0, 1, 1], [], []>} : vector<16x128xf32>, vector<128x128xf32>, vector<16x128xf32> -> vector<16x128xf32>
    %24 = vector.broadcast %22 : vector<1x128xf32> to vector<16x128xf32>
    %25 = arith.addf %23, %24 : vector<16x128xf32>
    %c0_20 = arith.constant 0 : index
    %c0_21 = arith.constant 0 : index
    %26 = vector.load %arg9[%c0_20, %c0_21] : memref<16x128xf32, #tpu.memory_space<vmem>>, vector<16x128xf32>
    tpu.vector_store %arg9[%c0_20, %c0_21], %25 {strides = array<i32>} : memref<16x128xf32, #tpu.memory_space<vmem>>, vector<16x128xf32>,
    return
  }
  func.func @transform_0(%arg0: i32) -> (i32, i32) {
    %c0_i32 = arith.constant 0 : i32
    %c0_i32_0 = arith.constant 0 : i32
    return %arg0, %c0_i32 : i32, i32
  }
  func.func @transform_1(%arg0: i32) -> (i32, i32) {
    %c0_i32 = arith.constant 0 : i32
    %c0_i32_0 = arith.constant 0 : i32
    return %arg0, %c0_i32 : i32, i32
  }
  func.func @transform_2(%arg0: i32) -> (i32, i32) {
    %c0_i32 = arith.constant 0 : i32
    %c0_i32_0 = arith.constant 0 : i32
    %c0_i32_1 = arith.constant 0 : i32
    return %c0_i32, %c0_i32_0 : i32, i32
  }
  func.func @transform_3(%arg0: i32) -> (i32, i32) {
    %c0_i32 = arith.constant 0 : i32
    %c0_i32_0 = arith.constant 0 : i32
    %c0_i32_1 = arith.constant 0 : i32
    return %c0_i32, %c0_i32_0 : i32, i32
  }
  func.func @transform_4(%arg0: i32) -> (i32, i32) {
    %c0_i32 = arith.constant 0 : i32
    %c0_i32_0 = arith.constant 0 : i32
    %c0_i32_1 = arith.constant 0 : i32
    return %c0_i32, %c0_i32_0 : i32, i32
  }
  func.func @transform_5(%arg0: i32) -> (i32, i32) {
    %c0_i32 = arith.constant 0 : i32
    %c0_i32_0 = arith.constant 0 : i32
    %c0_i32_1 = arith.constant 0 : i32
    return %c0_i32, %c0_i32_0 : i32, i32
  }
  func.func @transform_6(%arg0: i32) -> (i32, i32) {
    %c0_i32 = arith.constant 0 : i32
    %c0_i32_0 = arith.constant 0 : i32
    %c0_i32_1 = arith.constant 0 : i32
    return %c0_i32, %c0_i32_0 : i32, i32
  }
  func.func @transform_7(%arg0: i32) -> (i32, i32) {
    %c0_i32 = arith.constant 0 : i32
    %c0_i32_0 = arith.constant 0 : i32
    %c0_i32_1 = arith.constant 0 : i32
    return %c0_i32, %c0_i32_0 : i32, i32
  }
  func.func @transform_8(%arg0: i32) -> (i32, i32) {
    %c0_i32 = arith.constant 0 : i32
    %c0_i32_0 = arith.constant 0 : i32
    return %arg0, %c0_i32 : i32, i32
  }
}

</mosaic_0001>

<bundles_post_ra>
// kernel: tpu_custom_call.1
= control target key start
LH: loop header
LB: loop body
LE: loop exit
PB: predicated region body
PF: predicated region fallthrough
CT: control target
= control target key end

     0   :  { %13 = vsyncpa [#allocation3], 0  ;;  %s985_s0 = inlined_call_operand.hbm [shape: f32[128,128], index: 0, kind: input, shape index: {}]   ;;  %s986_s1 = inlined_call_operand.vmem [shape: f32[16,8], index: 1, kind: input, shape index: {}]   ;;  %s987_s2 = inlined_call_operand.hbm [shape: f32[128,128], index: 2, kind: input, shape index: {}]   ;;  %s988_s3 = inlined_call_operand.vmem [shape: f32[1,128], index: 3, kind: input, shape index: {}]   ;;  %s989_s4 = inlined_call_operand.hbm [shape: f32[128,128], index: 4, kind: input, shape index: {}]   ;;  %s990_s5 = inlined_call_operand.vmem [shape: f32[1,128], index: 5, kind: input, shape index: {}]   ;;  %s991_s6 = inlined_call_operand.hbm [shape: f32[128,128], index: 6, kind: input, shape index: {}]   ;;  %s992_s7 = inlined_call_operand.vmem [shape: f32[1,128], index: 7, kind: input, shape index: {}]   ;;  %s993_s8 = inlined_call_operand.hbm [shape: f32[16,128], index: 8, kind: output, shape index: {}]  }
   0x1   :  { %14 = vsyncpa [#allocation6], 0 }
   0x2   :  { %15 = vsyncpa [#allocation9], 0 }
   0x3   :  { %16 = vsyncpa [#allocation4], 0  ;;  %s36_s29 = sshll.u32 %s987_s2, 4  ;;  %s815_s30 = smov [#allocation5]   ;;  %s37_s29 = int_to_ptr.hbm [resolvable:$true] %s36_s29 }
   0x4   :  { %s38_s9 = sshll.u32 %s815_s30, 4  ;;  %s21_s12 = sshll.u32 %s985_s0, 4  ;;  %s39_s9 = int_to_ptr.vmem [resolvable:$true] %s38_s9  ;;  %s22_s12 = int_to_ptr.hbm [resolvable:$true] %s21_s12 }
   0x5   :  { %s816_s13 = smov 128   ;;  %s817_s14 = smov 8  }
   0x6   :  { %44 = dma.hbm_to_vmem [thread:$0]  %s37_s29, 2048, %s39_s9, [#allocation6], %s816_s13, %s816_s13, %s817_s14  }
   0x7   :  { %s818_s15 = smov [#allocation2]   ;;  %s51_s2 = sshll.u32 %s989_s4, 4  ;;  %s52_s2 = int_to_ptr.hbm [resolvable:$true] %s51_s2 }
   0x8   :  { %s23_s16 = sshll.u32 %s818_s15, 4  ;;  %s66_s20 = sshll.u32 %s991_s6, 4  ;;  %s24_s16 = int_to_ptr.vmem [resolvable:$true] %s23_s16  ;;  %s67_s20 = int_to_ptr.hbm [resolvable:$true] %s66_s20 }
   0x9   :  { %29 = dma.hbm_to_vmem [thread:$0]  %s22_s12, 2048, %s24_s16, [#allocation3], %s816_s13, %s816_s13, %s817_s14  }
   0xa   :  { %s819_s21 = smov [#allocation7]   ;;  %s820_s23 = smov [#allocation8]  }
   0xb   :  { %s53_s22 = sshll.u32 %s819_s21, 4  ;;  %s68_s4 = sshll.u32 %s820_s23, 4  ;;  %s54_s22 = int_to_ptr.vmem [resolvable:$true] %s53_s22  ;;  %s69_s4 = int_to_ptr.vmem [resolvable:$true] %s68_s4 }
   0xc   :  { %59 = dma.hbm_to_vmem [thread:$0]  %s52_s2, 2048, %s54_s22, [#allocation6], %s816_s13, %s816_s13, %s817_s14  }
   0xd   :  { %74 = dma.hbm_to_vmem [thread:$0]  %s67_s20, 2048, %s69_s4, [#allocation9], %s816_s13, %s816_s13, %s817_s14  }
   0xe   :  { %807 = dma.done.wait [#allocation3], 2048  }
   0xf   :  { %808 = vsyncadd [#allocation3], 4294965248 }
  0x10   :  { %809 = dma.done.wait [#allocation6], 4096  }
  0x11   :  { %810 = vsyncadd [#allocation6], 4294963200 }
  0x12   :  { %811 = dma.done.wait [#allocation9], 2048  }
  0x13   :  { %812 = vsyncadd [#allocation9], 4294965248  ;;  %v124_v0 = vld [vmem:[#allocation5 + $0x78] sm:$0xff]  ;;  %v123_v1 = vld [vmem:[#allocation5 + $0x70] sm:$0xff]  ;;  %v314_v45 = vlaneseq  ;;  %vm573_vm0 = vcmask 1041409   ;;  %vm575_vm1 = vcmask 1042434  }
  0x14   :  { %129 = vmatpush.msra.mxu0 %v124_v0  ;;  %642 = vmatpush.msra.mxu3 %v124_v0  ;;  %v122_v2 = vld [vmem:[#allocation5 + $0x68] sm:$0xff]  ;;  %v121_v3 = vld [vmem:[#allocation5 + $0x60] sm:$0xff]  ;;  %v120_v4 = vld [vmem:[#allocation5 + $0x58] sm:$0xff]  ;;  %vm577_vm2 = vcmask 1043459   ;;  %vm579_vm3 = vcmask 1044484   ;;  %vm581_vm4 = vcmask 1045509  }
  0x15   :  { %v119_v5 = vld [vmem:[#allocation5 + $0x50] sm:$0xff]  ;;  %v118_v6 = vld [vmem:[#allocation5 + $0x48] sm:$0xff]  ;;  %v117_v7 = vld [vmem:[#allocation5 + $0x40] sm:$0xff]  ;;  %v315_v47 = vshrl.u32 %v314_v45, 7  ;;  %vm583_vm5 = vcmask 1046534   ;;  %vm585_vm6 = vcmask 1047559  }
  0x16   :  { %130 = vmatpush.msra.mxu0 %v123_v1  ;;  %643 = vmatpush.msra.mxu3 %v123_v1  ;;  %v116_v8 = vld [vmem:[#allocation5 + $0x38] sm:$0xff]  ;;  %v115_v9 = vld [vmem:[#allocation5 + $0x30] sm:$0xff]  ;;  %v114_v10 = vld [vmem:[#allocation5 + $0x28] sm:$0xff]  ;;  %s821_s30 = smov [#allocation10]   ;;  %s627_s12 = sshll.u32 %s993_s8, 4  ;;  %s628_s12 = int_to_ptr.hbm [resolvable:$true] %s627_s12 }
  0x17   :  { %v113_v11 = vld [vmem:[#allocation5 + $0x20] sm:$0xff]  ;;  %v112_v12 = vld [vmem:[#allocation5 + $0x18] sm:$0xff]  ;;  %v111_v13 = vld [vmem:[#allocation5 + $0x10] sm:$0xff]  ;;  %681 = vset.pattern.permute.xlu0 %v315_v47  ;;  %682 = vset.pattern.permute.xlu1 %v315_v47  ;;  %s625_s9 = sshll.u32 %s821_s30, 4  ;;  %s626_s9 = int_to_ptr.vmem [resolvable:$true] %s625_s9 }
  0x18   :  { %131 = vmatpush.msra.mxu0 %v122_v2  ;;  %644 = vmatpush.msra.mxu3 %v122_v2  ;;  %v110_v14 = vld [vmem:[#allocation5 + $0x8] sm:$0xff]  ;;  %v109_v15 = vld [vmem:[#allocation5] sm:$0xff]  ;;  %v103_v19 = vld [vmem:[#allocation2 + $0x50] sm:$0xff] }
  0x19   :  { %v93_v16 = vld [vmem:[#allocation2] sm:$0xff]  ;;  %v102_v17 = vld [vmem:[#allocation2 + $0x48] sm:$0xff]  ;;  %v95_v20 = vld [vmem:[#allocation2 + $0x10] sm:$0xff]  ;;  %683 = vset.pattern.permute.xlu2 %v315_v47 }
  0x1a   :  { %132 = vmatpush.msra.mxu0 %v121_v3  ;;  %645 = vmatpush.msra.mxu3 %v121_v3  ;;  %v94_v18 = vld [vmem:[#allocation2 + $0x8] sm:$0xff]  ;;  %v104_v21 = vld [vmem:[#allocation2 + $0x58] sm:$0xff]  ;;  %v105_v23 = vld [vmem:[#allocation2 + $0x60] sm:$0xff] }
  0x1b   :  { %v96_v22 = vld [vmem:[#allocation2 + $0x18] sm:$0xff]  ;;  %v97_v24 = vld [vmem:[#allocation2 + $0x20] sm:$0xff]  ;;  %v106_v25 = vld [vmem:[#allocation2 + $0x68] sm:$0xff] }
  0x1c   :  { %133 = vmatpush.msra.mxu0 %v120_v4  ;;  %646 = vmatpush.msra.mxu3 %v120_v4  ;;  %v225_v26 = vld [vmem:[#allocation7 + $0x78] sm:$0xff]  ;;  %v224_v27 = vld [vmem:[#allocation7 + $0x70] sm:$0xff]  ;;  %v223_v28 = vld [vmem:[#allocation7 + $0x68] sm:$0xff] }
  0x1d   :  { %230 = vmatpush.msra.mxu1 %v225_v26  ;;  %658 = vmatpush.msra.mxu2 %v225_v26  ;;  %v222_v29 = vld [vmem:[#allocation7 + $0x60] sm:$0xff]  ;;  %v98_v30 = vld [vmem:[#allocation2 + $0x28] sm:$0xff]  ;;  %v107_v31 = vld [vmem:[#allocation2 + $0x70] sm:$0xff] }
  0x1e   :  { %134 = vmatpush.msra.mxu0 %v119_v5  ;;  %647 = vmatpush.msra.mxu3 %v119_v5  ;;  %v221_v32 = vld [vmem:[#allocation7 + $0x58] sm:$0xff]  ;;  %v220_v33 = vld [vmem:[#allocation7 + $0x50] sm:$0xff]  ;;  %v219_v34 = vld [vmem:[#allocation7 + $0x48] sm:$0xff] }
  0x1f   :  { %231 = vmatpush.msra.mxu1 %v224_v27  ;;  %659 = vmatpush.msra.mxu2 %v224_v27  ;;  %v218_v35 = vld [vmem:[#allocation7 + $0x40] sm:$0xff]  ;;  %v99_v36 = vld [vmem:[#allocation2 + $0x30] sm:$0xff]  ;;  %v108_v37 = vld [vmem:[#allocation2 + $0x78] sm:$0xff] }
  0x20   :  { %135 = vmatpush.msra.mxu0 %v118_v6  ;;  %648 = vmatpush.msra.mxu3 %v118_v6  ;;  %v217_v38 = vld [vmem:[#allocation7 + $0x38] sm:$0xff]  ;;  %v216_v39 = vld [vmem:[#allocation7 + $0x30] sm:$0xff]  ;;  %v215_v40 = vld [vmem:[#allocation7 + $0x28] sm:$0xff] }
  0x21   :  { %232 = vmatpush.msra.mxu1 %v223_v28  ;;  %660 = vmatpush.msra.mxu2 %v223_v28  ;;  %v214_v41 = vld [vmem:[#allocation7 + $0x20] sm:$0xff]  ;;  %v100_v42 = vld [vmem:[#allocation2 + $0x38] sm:$0xff]  ;;  %v212_v46 = vld [vmem:[#allocation7 + $0x10] sm:$0xff] }
  0x22   :  { %136 = vmatpush.msra.mxu0 %v117_v7  ;;  %649 = vmatpush.msra.mxu3 %v117_v7  ;;  %v213_v43 = vld [vmem:[#allocation7 + $0x18] sm:$0xff]  ;;  %v101_v44 = vld [vmem:[#allocation2 + $0x40] sm:$0xff]  ;;  %v211_v48 = vld [vmem:[#allocation7 + $0x8] sm:$0xff] }
  0x23   :  { %233 = vmatpush.msra.mxu1 %v222_v29  ;;  %661 = vmatpush.msra.mxu2 %v222_v29  ;;  %v210_v49 = vld [vmem:[#allocation7] sm:$0xff]  ;;  %v902_v57 = vld [vmem:[%s986_s1 + $0x8] sm:$0xff] }
  0x24   :  { %137 = vmatpush.msra.mxu0 %v116_v8  ;;  %650 = vmatpush.msra.mxu3 %v116_v8  ;;  %v311_v50 = vld [vmem:[%s986_s1] sm:$0xff]  ;;  %v376_v59 = vperm.slane %v902_v57, 1  ;;  %v397_v2 = vperm.slane %v902_v57, 4  ;;  %v383_v5 = vperm.slane %v902_v57, 2 }
  0x25   :  { %234 = vmatpush.msra.mxu1 %v221_v32  ;;  %662 = vmatpush.msra.mxu2 %v221_v32  ;;  %v313_v51 = vperm.slane %v311_v50, 0  ;;  %v320_v52 = vperm.slane %v311_v50, 1  ;;  %v327_v53 = vperm.slane %v311_v50, 2  ;;  %v355_v54 = vperm.slane %v311_v50, 6  ;;  %v897_v56 = vld [vmem:[%s988_s3] ss:$0 sm:$0xff] }
  0x26   :  { %138 = vmatpush.msra.mxu0 %v115_v9  ;;  %651 = vmatpush.msra.mxu3 %v115_v9  ;;  %v334_v55 = vperm.slane %v311_v50, 3  ;;  %v362_v61 = vperm.slane %v311_v50, 7  ;;  %v341_v9 = vperm.slane %v311_v50, 4 }
  0x27   :  { %235 = vmatpush.msra.mxu1 %v220_v33  ;;  %663 = vmatpush.msra.mxu2 %v220_v33 }
  0x28   :  { %139 = vmatpush.msra.mxu0 %v114_v10  ;;  %652 = vmatpush.msra.mxu3 %v114_v10 }
  0x29   :  { %236 = vmatpush.msra.mxu1 %v219_v34  ;;  %664 = vmatpush.msra.mxu2 %v219_v34 }
  0x2a   :  { %140 = vmatpush.msra.mxu0 %v113_v11  ;;  %653 = vmatpush.msra.mxu3 %v113_v11  ;;  %v418_v11 = vperm.slane %v902_v57, 7 }
  0x2b   :  { %237 = vmatpush.msra.mxu1 %v218_v35  ;;  %665 = vmatpush.msra.mxu2 %v218_v35 }
  0x2c   :  { %141 = vmatpush.msra.mxu0 %v112_v12  ;;  %654 = vmatpush.msra.mxu3 %v112_v12 }
  0x2d   :  { %238 = vmatpush.msra.mxu1 %v217_v38  ;;  %666 = vmatpush.msra.mxu2 %v217_v38 }
  0x2e   :  { %142 = vmatpush.msra.mxu0 %v111_v13  ;;  %655 = vmatpush.msra.mxu3 %v111_v13 }
  0x2f   :  { %239 = vmatpush.msra.mxu1 %v216_v39  ;;  %667 = vmatpush.msra.mxu2 %v216_v39 }
  0x30   :  { %143 = vmatpush.msra.mxu0 %v110_v14  ;;  %656 = vmatpush.msra.mxu3 %v110_v14 }
  0x31   :  { %240 = vmatpush.msra.mxu1 %v215_v40  ;;  %668 = vmatpush.msra.mxu2 %v215_v40 }
  0x32   :  { %144 = vmatpush.msra.mxu0 %v109_v15  ;;  %657 = vmatpush.msra.mxu3 %v109_v15 }
  0x33   :  { %145 = vmatmul.f32.vlgmr.msra.gmra.mxu0 %v93_v16  ;;  %172 = vmatmul.f32.vlgmr.msra.gmra.mxu3 %v102_v17  ;;  %v404_v16 = vperm.slane %v902_v57, 5 }
  0x34   :  { %241 = vmatpush.msra.mxu1 %v214_v41  ;;  %669 = vmatpush.msra.mxu2 %v214_v41 }
  0x35   :  { %318 = vperm.xlu0 %681, %v313_v51   ;;  %332 = vperm.xlu1 %682, %v327_v53  }
  0x36   :  { %242 = vmatpush.msra.mxu1 %v213_v43  ;;  %670 = vmatpush.msra.mxu2 %v213_v43 }
  0x37   :  { %346 = vperm.xlu2 %683, %v341_v9   ;;  %v545_v9 = vld [vmem:[#allocation8 + $0x40] sm:$0xff] }
  0x38   :  { %243 = vmatpush.msra.mxu1 %v212_v46  ;;  %671 = vmatpush.msra.mxu2 %v212_v46 }
  0x3a   :  { %244 = vmatpush.msra.mxu1 %v211_v48  ;;  %672 = vmatpush.msra.mxu2 %v211_v48 }
  0x3b   :  { %148 = vmatmul.f32.gmra.mxu0 %v94_v18  ;;  %175 = vmatmul.f32.gmra.mxu3 %v103_v19  ;;  %v348_v18 = vperm.slane %v311_v50, 5 }
  0x3c   :  { %245 = vmatpush.msra.mxu1 %v210_v49  ;;  %673 = vmatpush.msra.mxu2 %v210_v49 }
  0x3d   :  { %325 = vperm.xlu0 %681, %v320_v52   ;;  %339 = vperm.xlu1 %682, %v334_v55   ;;  %v552_v55 = vld [vmem:[#allocation8 + $0x78] sm:$0xff] }
  0x3e   :  { %596 = vmatpush.msrb.mxu2 %v552_v55 }
  0x3f   :  { %353 = vperm.xlu2 %683, %v348_v18  }
  0x43   :  { %151 = vmatmul.f32.gmra.mxu0 %v95_v20  ;;  %178 = vmatmul.f32.gmra.mxu3 %v104_v21 }
  0x45   :  { %360 = vperm.xlu0 %681, %v355_v54   ;;  %367 = vperm.xlu1 %682, %v362_v61   ;;  %v550_v61 = vld [vmem:[#allocation8 + $0x68] sm:$0xff] }
  0x4b   :  { %154 = vmatmul.f32.gmra.mxu0 %v96_v22  ;;  %181 = vmatmul.f32.gmra.mxu3 %v105_v23 }
  0x4d   :  { %381 = vperm.xlu0 %681, %v376_v59   ;;  %388 = vperm.xlu1 %682, %v383_v5  }
  0x53   :  { %157 = vmatmul.f32.gmra.mxu0 %v97_v24  ;;  %184 = vmatmul.f32.gmra.mxu3 %v106_v25  ;;  %v369_v25 = vperm.slane %v902_v57, 0 }
  0x55   :  { %402 = vperm.xlu0 %681, %v397_v2   ;;  %409 = vperm.xlu1 %682, %v404_v16  }
  0x56   :  { %374 = vperm.xlu2 %683, %v369_v25  }
  0x5b   :  { %160 = vmatmul.f32.gmra.mxu0 %v98_v30  ;;  %187 = vmatmul.f32.gmra.mxu3 %v107_v31  ;;  %v390_v30 = vperm.slane %v902_v57, 3 }
  0x5d   :  { %423 = vperm.xlu0 %681, %v418_v11  }
  0x5e   :  { %395 = vperm.xlu2 %683, %v390_v30  }
  0x63   :  { %163 = vmatmul.f32.gmra.mxu0 %v99_v36  ;;  %190 = vmatmul.f32.gmra.mxu3 %v108_v37  ;;  %v411_v37 = vperm.slane %v902_v57, 6  ;;  %v551_v57 = vld [vmem:[#allocation8 + $0x70] sm:$0xff] }
  0x64   :  { %597 = vmatpush.msrb.mxu2 %v551_v57 }
  0x66   :  { %416 = vperm.xlu2 %683, %v411_v37   ;;  %598 = vmatpush.msrb.mxu2 %v550_v61 }
  0x6b   :  { %166 = vmatmul.f32.gmra.mxu0 %v100_v42 }
  0x73   :  { %169 = vmatmul.f32.gmra.mxu0 %v101_v44 }
  0xa7   :  { %v319_v59 = vpop.permute.xlu0 %318  ;;  %v333_v2 = vpop.permute.xlu1 %332 }
  0xb0   :  { %v146_v58 = vpop.f32.mrf.mxu0 }
  0xb1   :  { %v147_v60 = vadd.f32 %v897_v56, %v146_v58 }
  0xb3   :  { %v194_v62 = vmax.f32 %v147_v60, 0.0 }
  0xb5   :  { %246 = vmatmul.f32.vlgmr.msra.gmra.mxu1 %v194_v62  ;;  %v549_v62 = vld [vmem:[#allocation8 + $0x60] sm:$0xff] }
  0xb6   :  { %v173_v63 = vpop.f32.mrf.mxu3  ;;  %599 = vmatpush.msrb.mxu2 %v549_v62 }
  0xb7   :  { %v174_v0 = vadd.f32 %v897_v56, %v173_v63 }
  0xb8   :  { %v149_v1 = vpop.f32.mrf.mxu0 }
  0xb9   :  { %v203_v3 = vmax.f32 %v174_v0, 0.0  ;;  %v150_v4 = vadd.f32 %v897_v56, %v149_v1  ;;  %v347_v0 = vpop.permute.xlu2 %346  ;;  %v548_v1 = vld [vmem:[#allocation8 + $0x58] sm:$0xff] }
  0xba   :  { %600 = vmatpush.msrb.mxu2 %v548_v1 }
  0xbb   :  { %v195_v6 = vmax.f32 %v150_v4, 0.0  ;;  %273 = vmatmul.f32.vlgmr.msra.gmra.mxu2 %v203_v3  ;;  %v547_v3 = vld [vmem:[#allocation8 + $0x50] sm:$0xff] }
  0xbc   :  { %601 = vmatpush.msrb.mxu2 %v547_v3 }
  0xbd   :  { %249 = vmatmul.f32.gmra.mxu1 %v195_v6  ;;  %v326_v6 = vpop.permute.xlu0 %325 }
  0xbe   :  { %v176_v7 = vpop.f32.mrf.mxu3 }
  0xbf   :  { %v177_v8 = vadd.f32 %v897_v56, %v176_v7  ;;  %v546_v7 = vld [vmem:[#allocation8 + $0x48] sm:$0xff] }
  0xc0   :  { %v152_v10 = vpop.f32.mrf.mxu0  ;;  %602 = vmatpush.msrb.mxu2 %v546_v7 }
  0xc1   :  { %v204_v12 = vmax.f32 %v177_v8, 0.0  ;;  %v153_v13 = vadd.f32 %v897_v56, %v152_v10 }
  0xc2   :  { %603 = vmatpush.msrb.mxu2 %v545_v9 }
  0xc3   :  { %v196_v14 = vmax.f32 %v153_v13, 0.0  ;;  %276 = vmatmul.f32.gmra.mxu2 %v204_v12  ;;  %v544_v12 = vld [vmem:[#allocation8 + $0x38] sm:$0xff] }
  0xc4   :  { %604 = vmatpush.msrb.mxu2 %v544_v12 }
  0xc5   :  { %252 = vmatmul.f32.gmra.mxu1 %v196_v14  ;;  %v354_v14 = vpop.permute.xlu2 %353 }
  0xc6   :  { %v179_v15 = vpop.f32.mrf.mxu3 }
  0xc7   :  { %v180_v17 = vadd.f32 %v897_v56, %v179_v15  ;;  %v543_v15 = vld [vmem:[#allocation8 + $0x30] sm:$0xff] }
  0xc8   :  { %v155_v19 = vpop.f32.mrf.mxu0  ;;  %605 = vmatpush.msrb.mxu2 %v543_v15 }
  0xc9   :  { %v205_v20 = vmax.f32 %v180_v17, 0.0  ;;  %v156_v21 = vadd.f32 %v897_v56, %v155_v19  ;;  %v340_v17 = vpop.permute.xlu1 %339 }
  0xcb   :  { %v197_v22 = vmax.f32 %v156_v21, 0.0  ;;  %279 = vmatmul.f32.gmra.mxu2 %v205_v20  ;;  %v542_v20 = vld [vmem:[#allocation8 + $0x28] sm:$0xff] }
  0xcc   :  { %606 = vmatpush.msrb.mxu2 %v542_v20 }
  0xcd   :  { %255 = vmatmul.f32.gmra.mxu1 %v197_v22  ;;  %v361_v22 = vpop.permute.xlu0 %360 }
  0xce   :  { %v182_v23 = vpop.f32.mrf.mxu3 }
  0xcf   :  { %v183_v24 = vadd.f32 %v897_v56, %v182_v23 }
  0xd0   :  { %v158_v26 = vpop.f32.mrf.mxu0 }
  0xd1   :  { %v206_v27 = vmax.f32 %v183_v24, 0.0  ;;  %v159_v28 = vadd.f32 %v897_v56, %v158_v26  ;;  %v541_v24 = vld [vmem:[#allocation8 + $0x20] sm:$0xff] }
  0xd2   :  { %607 = vmatpush.msrb.mxu2 %v541_v24 }
  0xd3   :  { %v198_v29 = vmax.f32 %v159_v28, 0.0  ;;  %282 = vmatmul.f32.gmra.mxu2 %v206_v27 }
  0xd5   :  { %258 = vmatmul.f32.gmra.mxu1 %v198_v29  ;;  %v540_v29 = vld [vmem:[#allocation8 + $0x18] sm:$0xff] }
  0xd6   :  { %v185_v31 = vpop.f32.mrf.mxu3  ;;  %608 = vmatpush.msrb.mxu2 %v540_v29 }
  0xd7   :  { %v186_v32 = vadd.f32 %v897_v56, %v185_v31 }
  0xd8   :  { %v161_v33 = vpop.f32.mrf.mxu0 }
  0xd9   :  { %v207_v34 = vmax.f32 %v186_v32, 0.0  ;;  %v162_v35 = vadd.f32 %v897_v56, %v161_v33  ;;  %v539_v33 = vld [vmem:[#allocation8 + $0x10] sm:$0xff] }
  0xda   :  { %609 = vmatpush.msrb.mxu2 %v539_v33 }
  0xdb   :  { %v199_v36 = vmax.f32 %v162_v35, 0.0  ;;  %285 = vmatmul.f32.gmra.mxu2 %v207_v34 }
  0xdd   :  { %261 = vmatmul.f32.gmra.mxu1 %v199_v36 }
  0xde   :  { %v188_v38 = vpop.f32.mrf.mxu3 }
  0xdf   :  { %v189_v39 = vadd.f32 %v897_v56, %v188_v38  ;;  %v941_v38 = vpop.permute.xlu2 %374 }
  0xe0   :  { %v164_v40 = vpop.f32.mrf.mxu0 }
  0xe1   :  { %v208_v41 = vmax.f32 %v189_v39, 0.0  ;;  %v165_v42 = vadd.f32 %v897_v56, %v164_v40  ;;  %v538_v39 = vld [vmem:[#allocation8 + $0x8] sm:$0xff] }
  0xe2   :  { %610 = vmatpush.msrb.mxu2 %v538_v39 }
  0xe3   :  { %v200_v43 = vmax.f32 %v165_v42, 0.0  ;;  %288 = vmatmul.f32.gmra.mxu2 %v208_v41  ;;  %v943_v41 = vpop.permute.xlu1 %367 }
  0xe5   :  { %264 = vmatmul.f32.gmra.mxu1 %v200_v43 }
  0xe6   :  { %v191_v44 = vpop.f32.mrf.mxu3 }
  0xe7   :  { %v192_v45 = vadd.f32 %v897_v56, %v191_v44 }
  0xe8   :  { %v167_v46 = vpop.f32.mrf.mxu0 }
  0xe9   :  { %v209_v47 = vmax.f32 %v192_v45, 0.0  ;;  %v168_v48 = vadd.f32 %v897_v56, %v167_v46  ;;  %v537_v45 = vld [vmem:[#allocation8] sm:$0xff] }
  0xea   :  { %611 = vmatpush.msrb.mxu2 %v537_v45 }
  0xeb   :  { %v201_v49 = vmax.f32 %v168_v48, 0.0  ;;  %291 = vmatmul.f32.gmra.mxu2 %v209_v47 }
  0xed   :  { %267 = vmatmul.f32.gmra.mxu1 %v201_v49 }
  0xf0   :  { %v170_v50 = vpop.f32.mrf.mxu0 }
  0xf1   :  { %v171_v51 = vadd.f32 %v897_v56, %v170_v50  ;;  %v933_v56 = vld [vmem:[%s990_s5] ss:$0 sm:$0xff] }
  0xf3   :  { %v202_v52 = vmax.f32 %v171_v51, 0.0  ;;  %v382_v51 = vpop.permute.xlu0 %381 }
  0xf5   :  { %270 = vmatmul.f32.gmra.mxu1 %v202_v52 }
 0x132   :  { %v247_v53 = vpop.f32.mrf.mxu1 }
 0x133   :  { %v248_v8 = vadd.f32 %v933_v56, %v247_v53 }
 0x135   :  { %v295_v13 = vmax.f32 %v248_v8, 0.0 }
 0x137   :  { %v425_v21 = vmul.f32 %v319_v59, %v295_v13 }
 0x139   :  { %v441_v30 = vrot.slane %v425_v21, 4 }
 0x13a   :  { %v250_v54 = vpop.f32.mrf.mxu1 }
 0x13b   :  { %v251_v4 = vadd.f32 %v933_v56, %v250_v54  ;;  %v442_v40 = vadd.f32 %v441_v30, %v425_v21  ;;  %v403_v21 = vpop.permute.xlu0 %402 }
 0x13d   :  { %v296_v10 = vmax.f32 %v251_v4, 0.0  ;;  %v443_v52 = vrot.slane %v442_v40, 2 }
 0x13e   :  { %v274_v58 = vpop.f32.mrf.mxu2 }
 0x13f   :  { %v426_v16 = vmul.f32 %v326_v6, %v296_v10  ;;  %v275_v31 = vadd.f32 %v933_v56, %v274_v58  ;;  %v396_v6 = vpop.permute.xlu2 %395  ;;  %v389_v10 = vpop.permute.xlu1 %388 }
 0x141   :  { %v447_v25 = vrot.slane %v426_v16, 4  ;;  %v304_v43 = vmax.f32 %v275_v31, 0.0 }
 0x142   :  { %v253_v60 = vpop.f32.mrf.mxu1 }
 0x143   :  { %v254_v18 = vadd.f32 %v933_v56, %v253_v60  ;;  %v448_v34 = vadd.f32 %v447_v25, %v426_v16  ;;  %v434_v54 = vmul.f32 %v382_v51, %v304_v43 }
 0x145   :  { %v297_v26 = vmax.f32 %v254_v18, 0.0  ;;  %v449_v46 = vrot.slane %v448_v34, 2  ;;  %v495_v3 = vrot.slane %v434_v54, 4 }
 0x146   :  { %v928_v63 = vpop.f32.mrf.mxu2 }
 0x147   :  { %v427_v35 = vmul.f32 %v333_v2, %v297_v26  ;;  %v278_v55 = vadd.f32 %v933_v56, %v928_v63  ;;  %v450_v58 = vadd.f32 %v449_v46, %v448_v34  ;;  %v444_v2 = vadd.f32 %v443_v52, %v442_v40  ;;  %v410_v46 = vpop.permute.xlu1 %409 }
 0x149   :  { %v453_v47 = vrot.slane %v427_v35, 4  ;;  %v305_v4 = vmax.f32 %v278_v55, 0.0  ;;  %v451_v8 = vrot.slane %v450_v58, 1 }
 0x14a   :  { %v256_v5 = vpop.f32.mrf.mxu1 }
 0x14b   :  { %v257_v23 = vadd.f32 %v933_v56, %v256_v5  ;;  %v454_v59 = vadd.f32 %v453_v47, %v427_v35  ;;  %v452_v25 = vadd.f32 %v451_v8, %v450_v58 }
 0x14d   :  { %v298_v32 = vmax.f32 %v257_v23, 0.0  ;;  %v455_v9 = vrot.slane %v454_v59, 2  ;;  %v435_v23 = vmul.f32 %v389_v10, %v305_v4 }
 0x14e   :  { %v280_v11 = vpop.f32.mrf.mxu2 }
 0x14f   :  { %v428_v44 = vmul.f32 %v340_v17, %v298_v32  ;;  %v445_v17 = vrot.slane %v444_v2, 1  ;;  %v456_v26 = vadd.f32 %v455_v9, %v454_v59 }
 0x151   :  { %v459_v57 = vrot.slane %v428_v44, 4  ;;  %v446_v33 = vadd.f32 %v445_v17, %v444_v2 }
 0x152   :  { %v259_v19 = vpop.f32.mrf.mxu1 }
 0x153   :  { %v260_v27 = vadd.f32 %v933_v56, %v259_v19  ;;  %v460_v5 = vadd.f32 %v459_v57, %v428_v44  ;;  %v953_v19 = vadd.f32 %v495_v3, %v434_v54  ;;  %v424_v3 = vpop.permute.xlu0 %423 }
 0x155   :  { %v299_v36 = vmax.f32 %v260_v27, 0.0  ;;  %v461_v20 = vrot.slane %v460_v5, 2  ;;  %v497_v43 = vrot.slane %v953_v19, 2 }
 0x156   :  { %v283_v28 = vpop.f32.mrf.mxu2 }
 0x157   :  { %v429_v48 = vmul.f32 %v347_v0, %v299_v36  ;;  %v281_v0 = vadd.f32 %v933_v56, %v280_v11  ;;  %v284_v12 = vadd.f32 %v933_v56, %v283_v28  ;;  %v462_v36 = vadd.f32 %v461_v20, %v460_v5 }
 0x159   :  { %v465_v60 = vrot.slane %v429_v48, 4  ;;  %v306_v18 = vmax.f32 %v281_v0, 0.0  ;;  %v307_v28 = vmax.f32 %v284_v12, 0.0  ;;  %v463_v58 = vrot.slane %v462_v36, 1 }
 0x15a   :  { %v262_v37 = vpop.f32.mrf.mxu1 }
 0x15b   :  { %v263_v42 = vadd.f32 %v933_v56, %v262_v37  ;;  %v466_v63 = vadd.f32 %v465_v60, %v429_v48  ;;  %v436_v34 = vmul.f32 %v396_v6, %v306_v18  ;;  %v501_v37 = vrot.slane %v435_v23, 4 }
 0x15c   :  { %v437_v45 = vmul.f32 %v403_v21, %v307_v28  ;;  %v574_v48 = vsel %vm573_vm0, %v452_v25, %v446_v33 }
 0x15d   :  { %v300_v49 = vmax.f32 %v263_v42, 0.0  ;;  %v467_v27 = vrot.slane %v466_v63, 2  ;;  %v457_v42 = vrot.slane %v456_v26, 1  ;;  %v502_v59 = vadd.f32 %v501_v37, %v435_v23 }
 0x15e   :  { %v286_v50 = vpop.f32.mrf.mxu2 }
 0x15f   :  { %v430_v53 = vmul.f32 %v354_v14, %v300_v49  ;;  %v287_v15 = vadd.f32 %v933_v56, %v286_v50  ;;  %v468_v44 = vadd.f32 %v467_v27, %v466_v63  ;;  %v417_v50 = vpop.permute.xlu2 %416  ;;  %v464_v63 = vadd.f32 %v463_v58, %v462_v36 }
 0x160   :  { %v503_v12 = vrot.slane %v502_v59, 2 }
 0x161   :  { %v471_v62 = vrot.slane %v430_v53, 4  ;;  %v308_v31 = vmax.f32 %v287_v15, 0.0 }
 0x162   :  { %v265_v61 = vpop.f32.mrf.mxu1 }
 0x163   :  { %v266_v1 = vadd.f32 %v933_v56, %v265_v61  ;;  %v472_v14 = vadd.f32 %v471_v62, %v430_v53  ;;  %v438_v51 = vmul.f32 %v410_v46, %v308_v31  ;;  %v507_v53 = vrot.slane %v436_v34, 4 }
 0x164   :  { %v458_v61 = vadd.f32 %v457_v42, %v456_v26  ;;  %v469_v62 = vrot.slane %v468_v44, 1 }
 0x165   :  { %v301_v7 = vmax.f32 %v266_v1, 0.0  ;;  %v473_v30 = vrot.slane %v472_v14, 2  ;;  %v513_v1 = vrot.slane %v437_v45, 4  ;;  %v519_v5 = vrot.slane %v438_v51, 4 }
 0x166   :  { %v289_v13 = vpop.f32.mrf.mxu2  ;;  %v470_v15 = vadd.f32 %v469_v62, %v468_v44  ;;  %v576_v18 = vsel %vm575_vm1, %v458_v61, %v574_v48 }
 0x167   :  { %v431_v16 = vmul.f32 %v361_v22, %v301_v7  ;;  %v290_v11 = vadd.f32 %v933_v56, %v289_v13  ;;  %v474_v49 = vadd.f32 %v473_v30, %v472_v14  ;;  %v508_v7 = vadd.f32 %v507_v53, %v436_v34 }
 0x168   :  { %v520_v20 = vadd.f32 %v519_v5, %v438_v51  ;;  %v498_v30 = vadd.f32 %v497_v43, %v953_v19 }
 0x169   :  { %v477_v24 = vrot.slane %v431_v16, 4  ;;  %v309_v35 = vmax.f32 %v290_v11, 0.0  ;;  %v475_v4 = vrot.slane %v474_v49, 1 }
 0x16a   :  { %v268_v29 = vpop.f32.mrf.mxu1  ;;  %v499_v19 = vrot.slane %v498_v30, 1 }
 0x16b   :  { %v478_v32 = vadd.f32 %v477_v24, %v431_v16  ;;  %v269_v22 = vadd.f32 %v933_v56, %v268_v29  ;;  %v439_v55 = vmul.f32 %v417_v50, %v309_v35  ;;  %v514_v16 = vadd.f32 %v513_v1, %v437_v45 }
 0x16c   :  { %v476_v11 = vadd.f32 %v475_v4, %v474_v49  ;;  %v509_v24 = vrot.slane %v508_v7, 2  ;;  %v578_v29 = vsel %vm577_vm2, %v464_v63, %v576_v18  ;;  %v504_v35 = vadd.f32 %v503_v12, %v502_v59 }
 0x16d   :  { %v479_v39 = vrot.slane %v478_v32, 2  ;;  %v302_v40 = vmax.f32 %v269_v22, 0.0  ;;  %v525_v9 = vrot.slane %v439_v55, 4  ;;  %v515_v31 = vrot.slane %v514_v16, 2 }
 0x16e   :  { %v292_v47 = vpop.f32.mrf.mxu2  ;;  %v521_v22 = vrot.slane %v520_v20, 2  ;;  %v500_v53 = vadd.f32 %v499_v19, %v498_v30 }
 0x16f   :  { %v432_v52 = vmul.f32 %v943_v41, %v302_v40  ;;  %v480_v54 = vadd.f32 %v479_v39, %v478_v32  ;;  %v293_v57 = vadd.f32 %v933_v56, %v292_v47  ;;  %v580_v32 = vsel %vm579_vm3, %v470_v15, %v578_v29 }
 0x170   :  { %v510_v39 = vadd.f32 %v509_v24, %v508_v7  ;;  %v516_v45 = vadd.f32 %v515_v31, %v514_v16  ;;  %v522_v43 = vadd.f32 %v521_v22, %v520_v20  ;;  %v505_v47 = vrot.slane %v504_v35, 1 }
 0x171   :  { %v483_v60 = vrot.slane %v432_v52, 4  ;;  %v310_v2 = vmax.f32 %v293_v57, 0.0  ;;  %v481_v8 = vrot.slane %v480_v54, 1 }
 0x172   :  { %v271_v0 = vpop.f32.mrf.mxu1  ;;  %v511_v49 = vrot.slane %v510_v39, 1  ;;  %v506_v57 = vadd.f32 %v505_v47, %v504_v35 }
 0x173   :  { %v484_v6 = vadd.f32 %v483_v60, %v432_v52  ;;  %v272_v41 = vadd.f32 %v933_v56, %v271_v0  ;;  %v440_v10 = vmul.f32 %v424_v3, %v310_v2  ;;  %v526_v56 = vadd.f32 %v525_v9, %v439_v55 }
 0x174   :  { %v482_v25 = vadd.f32 %v481_v8, %v480_v54  ;;  %v517_v52 = vrot.slane %v516_v45, 1  ;;  %v523_v54 = vrot.slane %v522_v43, 1  ;;  %v512_v59 = vadd.f32 %v511_v49, %v510_v39  ;;  %v686_v8 = vld [vmem:[%s992_s7] ss:$0 sm:$0xff] }
 0x175   :  { %v485_v13 = vrot.slane %v484_v6, 2  ;;  %v303_v14 = vmax.f32 %v272_v41, 0.0  ;;  %v531_v17 = vrot.slane %v440_v10, 4  ;;  %v527_v36 = vrot.slane %v526_v56, 2 }
 0x176   :  { %v518_v62 = vadd.f32 %v517_v52, %v516_v45  ;;  %v524_v2 = vadd.f32 %v523_v54, %v522_v43 }
 0x177   :  { %v486_v21 = vadd.f32 %v485_v13, %v484_v6  ;;  %v433_v23 = vmul.f32 %v941_v38, %v303_v14  ;;  %v532_v26 = vadd.f32 %v531_v17, %v440_v10  ;;  %v582_v38 = vsel %vm581_vm4, %v476_v11, %v580_v32 }
 0x178   :  { %v584_v37 = vsel %vm583_vm5, %v482_v25, %v582_v38  ;;  %v528_v48 = vadd.f32 %v527_v36, %v526_v56 }
 0x179   :  { %v489_v27 = vrot.slane %v433_v23, 4  ;;  %v487_v28 = vrot.slane %v486_v21, 1  ;;  %v533_v40 = vrot.slane %v532_v26, 2 }
 0x17a   :  { %v529_v58 = vrot.slane %v528_v48, 1 }
 0x17b   :  { %v490_v33 = vadd.f32 %v489_v27, %v433_v23  ;;  %v488_v34 = vadd.f32 %v487_v28, %v486_v21  ;;  %v534_v51 = vadd.f32 %v533_v40, %v532_v26 }
 0x17c   :  { %v530_v3 = vadd.f32 %v529_v58, %v528_v48 }
 0x17d   :  { %v491_v42 = vrot.slane %v490_v33, 2  ;;  %v586_v44 = vsel %vm585_vm6, %v488_v34, %v584_v37  ;;  %v535_v61 = vrot.slane %v534_v51, 1 }
 0x17e   :  { %612 = vmatmul.f32.vlgmr.msrb.gmra.mxu2 %v586_v44 }
 0x17f   :  { %v492_v46 = vadd.f32 %v491_v42, %v490_v33  ;;  %v536_v5 = vadd.f32 %v535_v61, %v534_v51 }
 0x181   :  { %v493_v50 = vrot.slane %v492_v46, 1 }
 0x183   :  { %v494_v55 = vadd.f32 %v493_v50, %v492_v46 }
 0x185   :  { %v587_v60 = vsel %vm573_vm0, %v500_v53, %v494_v55 }
 0x186   :  { %v588_v1 = vsel %vm575_vm1, %v506_v57, %v587_v60 }
 0x187   :  { %v589_v0 = vsel %vm577_vm2, %v512_v59, %v588_v1 }
 0x188   :  { %v590_v4 = vsel %vm579_vm3, %v518_v62, %v589_v0 }
 0x189   :  { %v591_v6 = vsel %vm581_vm4, %v524_v2, %v590_v4 }
 0x18a   :  { %v592_v41 = vsel %vm583_vm5, %v530_v3, %v591_v6 }
 0x18b   :  { %v593_v7 = vsel %vm585_vm6, %v536_v5, %v592_v41 }
 0x18c   :  { %615 = vmatmul.f32.gmra.mxu2 %v593_v7 }
 0x201   :  { %v613_v9 = vpop.f32.mrf.mxu2 }
 0x202   :  { %v614_v10 = vadd.f32 %v686_v8, %v613_v9 }
 0x204   :  { %619 = vst [vmem:[#allocation10] sm:$0xff] %v614_v10 }
 0x20f   :  { %v616_v63 = vpop.f32.mrf.mxu2 }
 0x210   :  { %v617_v12 = vadd.f32 %v686_v8, %v616_v63 }
 0x212   :  { %620 = vst [vmem:[#allocation10 + $0x8] sm:$0xff] %v617_v12 }
 0x213   :  { %633 = dma.vmem_to_hbm [thread:$0]  %s626_s9, 256, %s628_s12, [#allocation4], %s816_s13, %s816_s13, %s817_s14  }
 0x214   :  { %813 = dma.done.wait [#allocation4], 256  }
 0x215   :  { %814 = vsyncadd [#allocation4], 4294967040 }
 0x216   :  { %638 = vsyncpa [#allocation3], 1 }
 0x217   :  { %639 = vsyncpa [#allocation6], 1 }
 0x218   :  { %640 = vsyncpa [#allocation9], 1 }
 0x219   :  { %641 = vsyncpa [#allocation4], 1 }

// kernel: tpu_custom_call.1
= control target key start
LH: loop header
LB: loop body
LE: loop exit
PB: predicated region body
PF: predicated region fallthrough
CT: control target
= control target key end

     0   :  { %13 = vsyncpa [#allocation3], 0  ;;  %s985_s0 = inlined_call_operand.hbm [shape: f32[128,128], index: 0, kind: input, shape index: {}]   ;;  %s986_s1 = inlined_call_operand.vmem [shape: f32[16,8], index: 1, kind: input, shape index: {}]   ;;  %s987_s2 = inlined_call_operand.hbm [shape: f32[128,128], index: 2, kind: input, shape index: {}]   ;;  %s988_s3 = inlined_call_operand.vmem [shape: f32[1,128], index: 3, kind: input, shape index: {}]   ;;  %s989_s4 = inlined_call_operand.hbm [shape: f32[128,128], index: 4, kind: input, shape index: {}]   ;;  %s990_s5 = inlined_call_operand.vmem [shape: f32[1,128], index: 5, kind: input, shape index: {}]   ;;  %s991_s6 = inlined_call_operand.hbm [shape: f32[128,128], index: 6, kind: input, shape index: {}]   ;;  %s992_s7 = inlined_call_operand.vmem [shape: f32[1,128], index: 7, kind: input, shape index: {}]   ;;  %s993_s8 = inlined_call_operand.hbm [shape: f32[16,128], index: 8, kind: output, shape index: {}]  }
   0x1   :  { %14 = vsyncpa [#allocation6], 0 }
   0x2   :  { %15 = vsyncpa [#allocation9], 0 }
   0x3   :  { %16 = vsyncpa [#allocation4], 0  ;;  %s36_s29 = sshll.u32 %s987_s2, 4  ;;  %s815_s30 = smov [#allocation5]   ;;  %s37_s29 = int_to_ptr.hbm [resolvable:$true] %s36_s29 }
   0x4   :  { %s38_s9 = sshll.u32 %s815_s30, 4  ;;  %s21_s12 = sshll.u32 %s985_s0, 4  ;;  %s39_s9 = int_to_ptr.vmem [resolvable:$true] %s38_s9  ;;  %s22_s12 = int_to_ptr.hbm [resolvable:$true] %s21_s12 }
   0x5   :  { %s816_s13 = smov 128   ;;  %s817_s14 = smov 8  }
   0x6   :  { %44 = dma.hbm_to_vmem [thread:$0]  %s37_s29, 2048, %s39_s9, [#allocation6], %s816_s13, %s816_s13, %s817_s14  }
   0x7   :  { %s818_s15 = smov [#allocation2]   ;;  %s51_s2 = sshll.u32 %s989_s4, 4  ;;  %s52_s2 = int_to_ptr.hbm [resolvable:$true] %s51_s2 }
   0x8   :  { %s23_s16 = sshll.u32 %s818_s15, 4  ;;  %s66_s20 = sshll.u32 %s991_s6, 4  ;;  %s24_s16 = int_to_ptr.vmem [resolvable:$true] %s23_s16  ;;  %s67_s20 = int_to_ptr.hbm [resolvable:$true] %s66_s20 }
   0x9   :  { %29 = dma.hbm_to_vmem [thread:$0]  %s22_s12, 2048, %s24_s16, [#allocation3], %s816_s13, %s816_s13, %s817_s14  }
   0xa   :  { %s819_s21 = smov [#allocation7]   ;;  %s820_s23 = smov [#allocation8]  }
   0xb   :  { %s53_s22 = sshll.u32 %s819_s21, 4  ;;  %s68_s4 = sshll.u32 %s820_s23, 4  ;;  %s54_s22 = int_to_ptr.vmem [resolvable:$true] %s53_s22  ;;  %s69_s4 = int_to_ptr.vmem [resolvable:$true] %s68_s4 }
   0xc   :  { %59 = dma.hbm_to_vmem [thread:$0]  %s52_s2, 2048, %s54_s22, [#allocation6], %s816_s13, %s816_s13, %s817_s14  }
   0xd   :  { %74 = dma.hbm_to_vmem [thread:$0]  %s67_s20, 2048, %s69_s4, [#allocation9], %s816_s13, %s816_s13, %s817_s14  }
   0xe   :  { %807 = dma.done.wait [#allocation3], 2048  }
   0xf   :  { %808 = vsyncadd [#allocation3], 4294965248 }
  0x10   :  { %809 = dma.done.wait [#allocation6], 4096  }
  0x11   :  { %810 = vsyncadd [#allocation6], 4294963200 }
  0x12   :  { %811 = dma.done.wait [#allocation9], 2048  }
  0x13   :  { %812 = vsyncadd [#allocation9], 4294965248  ;;  %v124_v0 = vld [vmem:[#allocation5 + $0x78] sm:$0xff]  ;;  %v123_v1 = vld [vmem:[#allocation5 + $0x70] sm:$0xff]  ;;  %v314_v45 = vlaneseq  ;;  %vm573_vm0 = vcmask 1041409   ;;  %vm575_vm1 = vcmask 1042434  }
  0x14   :  { %129 = vmatpush.msra.mxu0 %v124_v0  ;;  %642 = vmatpush.msra.mxu3 %v124_v0  ;;  %v122_v2 = vld [vmem:[#allocation5 + $0x68] sm:$0xff]  ;;  %v121_v3 = vld [vmem:[#allocation5 + $0x60] sm:$0xff]  ;;  %v120_v4 = vld [vmem:[#allocation5 + $0x58] sm:$0xff]  ;;  %vm577_vm2 = vcmask 1043459   ;;  %vm579_vm3 = vcmask 1044484   ;;  %vm581_vm4 = vcmask 1045509  }
  0x15   :  { %v119_v5 = vld [vmem:[#allocation5 + $0x50] sm:$0xff]  ;;  %v118_v6 = vld [vmem:[#allocation5 + $0x48] sm:$0xff]  ;;  %v117_v7 = vld [vmem:[#allocation5 + $0x40] sm:$0xff]  ;;  %v315_v47 = vshrl.u32 %v314_v45, 7  ;;  %vm583_vm5 = vcmask 1046534   ;;  %vm585_vm6 = vcmask 1047559  }
  0x16   :  { %130 = vmatpush.msra.mxu0 %v123_v1  ;;  %643 = vmatpush.msra.mxu3 %v123_v1  ;;  %v116_v8 = vld [vmem:[#allocation5 + $0x38] sm:$0xff]  ;;  %v115_v9 = vld [vmem:[#allocation5 + $0x30] sm:$0xff]  ;;  %v114_v10 = vld [vmem:[#allocation5 + $0x28] sm:$0xff]  ;;  %s821_s30 = smov [#allocation10]   ;;  %s627_s12 = sshll.u32 %s993_s8, 4  ;;  %s628_s12 = int_to_ptr.hbm [resolvable:$true] %s627_s12 }
  0x17   :  { %v113_v11 = vld [vmem:[#allocation5 + $0x20] sm:$0xff]  ;;  %v112_v12 = vld [vmem:[#allocation5 + $0x18] sm:$0xff]  ;;  %v111_v13 = vld [vmem:[#allocation5 + $0x10] sm:$0xff]  ;;  %681 = vset.pattern.permute.xlu0 %v315_v47  ;;  %682 = vset.pattern.permute.xlu1 %v315_v47  ;;  %s625_s9 = sshll.u32 %s821_s30, 4  ;;  %s626_s9 = int_to_ptr.vmem [resolvable:$true] %s625_s9 }
  0x18   :  { %131 = vmatpush.msra.mxu0 %v122_v2  ;;  %644 = vmatpush.msra.mxu3 %v122_v2  ;;  %v110_v14 = vld [vmem:[#allocation5 + $0x8] sm:$0xff]  ;;  %v109_v15 = vld [vmem:[#allocation5] sm:$0xff]  ;;  %v103_v19 = vld [vmem:[#allocation2 + $0x50] sm:$0xff] }
  0x19   :  { %v93_v16 = vld [vmem:[#allocation2] sm:$0xff]  ;;  %v102_v17 = vld [vmem:[#allocation2 + $0x48] sm:$0xff]  ;;  %v95_v20 = vld [vmem:[#allocation2 + $0x10] sm:$0xff]  ;;  %683 = vset.pattern.permute.xlu2 %v315_v47 }
  0x1a   :  { %132 = vmatpush.msra.mxu0 %v121_v3  ;;  %645 = vmatpush.msra.mxu3 %v121_v3  ;;  %v94_v18 = vld [vmem:[#allocation2 + $0x8] sm:$0xff]  ;;  %v104_v21 = vld [vmem:[#allocation2 + $0x58] sm:$0xff]  ;;  %v105_v23 = vld [vmem:[#allocation2 + $0x60] sm:$0xff] }
  0x1b   :  { %v96_v22 = vld [vmem:[#allocation2 + $0x18] sm:$0xff]  ;;  %v97_v24 = vld [vmem:[#allocation2 + $0x20] sm:$0xff]  ;;  %v106_v25 = vld [vmem:[#allocation2 + $0x68] sm:$0xff] }
  0x1c   :  { %133 = vmatpush.msra.mxu0 %v120_v4  ;;  %646 = vmatpush.msra.mxu3 %v120_v4  ;;  %v225_v26 = vld [vmem:[#allocation7 + $0x78] sm:$0xff]  ;;  %v224_v27 = vld [vmem:[#allocation7 + $0x70] sm:$0xff]  ;;  %v223_v28 = vld [vmem:[#allocation7 + $0x68] sm:$0xff] }
  0x1d   :  { %230 = vmatpush.msra.mxu1 %v225_v26  ;;  %658 = vmatpush.msra.mxu2 %v225_v26  ;;  %v222_v29 = vld [vmem:[#allocation7 + $0x60] sm:$0xff]  ;;  %v98_v30 = vld [vmem:[#allocation2 + $0x28] sm:$0xff]  ;;  %v107_v31 = vld [vmem:[#allocation2 + $0x70] sm:$0xff] }
  0x1e   :  { %134 = vmatpush.msra.mxu0 %v119_v5  ;;  %647 = vmatpush.msra.mxu3 %v119_v5  ;;  %v221_v32 = vld [vmem:[#allocation7 + $0x58] sm:$0xff]  ;;  %v220_v33 = vld [vmem:[#allocation7 + $0x50] sm:$0xff]  ;;  %v219_v34 = vld [vmem:[#allocation7 + $0x48] sm:$0xff] }
  0x1f   :  { %231 = vmatpush.msra.mxu1 %v224_v27  ;;  %659 = vmatpush.msra.mxu2 %v224_v27  ;;  %v218_v35 = vld [vmem:[#allocation7 + $0x40] sm:$0xff]  ;;  %v99_v36 = vld [vmem:[#allocation2 + $0x30] sm:$0xff]  ;;  %v108_v37 = vld [vmem:[#allocation2 + $0x78] sm:$0xff] }
  0x20   :  { %135 = vmatpush.msra.mxu0 %v118_v6  ;;  %648 = vmatpush.msra.mxu3 %v118_v6  ;;  %v217_v38 = vld [vmem:[#allocation7 + $0x38] sm:$0xff]  ;;  %v216_v39 = vld [vmem:[#allocation7 + $0x30] sm:$0xff]  ;;  %v215_v40 = vld [vmem:[#allocation7 + $0x28] sm:$0xff] }
  0x21   :  { %232 = vmatpush.msra.mxu1 %v223_v28  ;;  %660 = vmatpush.msra.mxu2 %v223_v28  ;;  %v214_v41 = vld [vmem:[#allocation7 + $0x20] sm:$0xff]  ;;  %v100_v42 = vld [vmem:[#allocation2 + $0x38] sm:$0xff]  ;;  %v212_v46 = vld [vmem:[#allocation7 + $0x10] sm:$0xff] }
  0x22   :  { %136 = vmatpush.msra.mxu0 %v117_v7  ;;  %649 = vmatpush.msra.mxu3 %v117_v7  ;;  %v213_v43 = vld [vmem:[#allocation7 + $0x18] sm:$0xff]  ;;  %v101_v44 = vld [vmem:[#allocation2 + $0x40] sm:$0xff]  ;;  %v211_v48 = vld [vmem:[#allocation7 + $0x8] sm:$0xff] }
  0x23   :  { %233 = vmatpush.msra.mxu1 %v222_v29  ;;  %661 = vmatpush.msra.mxu2 %v222_v29  ;;  %v210_v49 = vld [vmem:[#allocation7] sm:$0xff]  ;;  %v902_v57 = vld [vmem:[%s986_s1 + $0x8] sm:$0xff] }
  0x24   :  { %137 = vmatpush.msra.mxu0 %v116_v8  ;;  %650 = vmatpush.msra.mxu3 %v116_v8  ;;  %v311_v50 = vld [vmem:[%s986_s1] sm:$0xff]  ;;  %v376_v59 = vperm.slane %v902_v57, 1  ;;  %v397_v2 = vperm.slane %v902_v57, 4  ;;  %v383_v5 = vperm.slane %v902_v57, 2 }
  0x25   :  { %234 = vmatpush.msra.mxu1 %v221_v32  ;;  %662 = vmatpush.msra.mxu2 %v221_v32  ;;  %v313_v51 = vperm.slane %v311_v50, 0  ;;  %v320_v52 = vperm.slane %v311_v50, 1  ;;  %v327_v53 = vperm.slane %v311_v50, 2  ;;  %v355_v54 = vperm.slane %v311_v50, 6  ;;  %v897_v56 = vld [vmem:[%s988_s3] ss:$0 sm:$0xff] }
  0x26   :  { %138 = vmatpush.msra.mxu0 %v115_v9  ;;  %651 = vmatpush.msra.mxu3 %v115_v9  ;;  %v334_v55 = vperm.slane %v311_v50, 3  ;;  %v362_v61 = vperm.slane %v311_v50, 7  ;;  %v341_v9 = vperm.slane %v311_v50, 4 }
  0x27   :  { %235 = vmatpush.msra.mxu1 %v220_v33  ;;  %663 = vmatpush.msra.mxu2 %v220_v33 }
  0x28   :  { %139 = vmatpush.msra.mxu0 %v114_v10  ;;  %652 = vmatpush.msra.mxu3 %v114_v10 }
  0x29   :  { %236 = vmatpush.msra.mxu1 %v219_v34  ;;  %664 = vmatpush.msra.mxu2 %v219_v34 }
  0x2a   :  { %140 = vmatpush.msra.mxu0 %v113_v11  ;;  %653 = vmatpush.msra.mxu3 %v113_v11  ;;  %v418_v11 = vperm.slane %v902_v57, 7 }
  0x2b   :  { %237 = vmatpush.msra.mxu1 %v218_v35  ;;  %665 = vmatpush.msra.mxu2 %v218_v35 }
  0x2c   :  { %141 = vmatpush.msra.mxu0 %v112_v12  ;;  %654 = vmatpush.msra.mxu3 %v112_v12 }
  0x2d   :  { %238 = vmatpush.msra.mxu1 %v217_v38  ;;  %666 = vmatpush.msra.mxu2 %v217_v38 }
  0x2e   :  { %142 = vmatpush.msra.mxu0 %v111_v13  ;;  %655 = vmatpush.msra.mxu3 %v111_v13 }
  0x2f   :  { %239 = vmatpush.msra.mxu1 %v216_v39  ;;  %667 = vmatpush.msra.mxu2 %v216_v39 }
  0x30   :  { %143 = vmatpush.msra.mxu0 %v110_v14  ;;  %656 = vmatpush.msra.mxu3 %v110_v14 }
  0x31   :  { %240 = vmatpush.msra.mxu1 %v215_v40  ;;  %668 = vmatpush.msra.mxu2 %v215_v40 }
  0x32   :  { %144 = vmatpush.msra.mxu0 %v109_v15  ;;  %657 = vmatpush.msra.mxu3 %v109_v15 }
  0x33   :  { %145 = vmatmul.f32.vlgmr.msra.gmra.mxu0 %v93_v16  ;;  %172 = vmatmul.f32.vlgmr.msra.gmra.mxu3 %v102_v17  ;;  %v404_v16 = vperm.slane %v902_v57, 5 }
  0x34   :  { %241 = vmatpush.msra.mxu1 %v214_v41  ;;  %669 = vmatpush.msra.mxu2 %v214_v41 }
  0x35   :  { %318 = vperm.xlu0 %681, %v313_v51   ;;  %332 = vperm.xlu1 %682, %v327_v53  }
  0x36   :  { %242 = vmatpush.msra.mxu1 %v213_v43  ;;  %670 = vmatpush.msra.mxu2 %v213_v43 }
  0x37   :  { %346 = vperm.xlu2 %683, %v341_v9   ;;  %v545_v9 = vld [vmem:[#allocation8 + $0x40] sm:$0xff] }
  0x38   :  { %243 = vmatpush.msra.mxu1 %v212_v46  ;;  %671 = vmatpush.msra.mxu2 %v212_v46 }
  0x3a   :  { %244 = vmatpush.msra.mxu1 %v211_v48  ;;  %672 = vmatpush.msra.mxu2 %v211_v48 }
  0x3b   :  { %148 = vmatmul.f32.gmra.mxu0 %v94_v18  ;;  %175 = vmatmul.f32.gmra.mxu3 %v103_v19  ;;  %v348_v18 = vperm.slane %v311_v50, 5 }
  0x3c   :  { %245 = vmatpush.msra.mxu1 %v210_v49  ;;  %673 = vmatpush.msra.mxu2 %v210_v49 }
  0x3d   :  { %325 = vperm.xlu0 %681, %v320_v52   ;;  %339 = vperm.xlu1 %682, %v334_v55   ;;  %v552_v55 = vld [vmem:[#allocation8 + $0x78] sm:$0xff] }
  0x3e   :  { %596 = vmatpush.msrb.mxu2 %v552_v55 }
  0x3f   :  { %353 = vperm.xlu2 %683, %v348_v18  }
  0x43   :  { %151 = vmatmul.f32.gmra.mxu0 %v95_v20  ;;  %178 = vmatmul.f32.gmra.mxu3 %v104_v21 }
  0x45   :  { %360 = vperm.xlu0 %681, %v355_v54   ;;  %367 = vperm.xlu1 %682, %v362_v61   ;;  %v550_v61 = vld [vmem:[#allocation8 + $0x68] sm:$0xff] }
  0x4b   :  { %154 = vmatmul.f32.gmra.mxu0 %v96_v22  ;;  %181 = vmatmul.f32.gmra.mxu3 %v105_v23 }
  0x4d   :  { %381 = vperm.xlu0 %681, %v376_v59   ;;  %388 = vperm.xlu1 %682, %v383_v5  }
  0x53   :  { %157 = vmatmul.f32.gmra.mxu0 %v97_v24  ;;  %184 = vmatmul.f32.gmra.mxu3 %v106_v25  ;;  %v369_v25 = vperm.slane %v902_v57, 0 }
  0x55   :  { %402 = vperm.xlu0 %681, %v397_v2   ;;  %409 = vperm.xlu1 %682, %v404_v16  }
  0x56   :  { %374 = vperm.xlu2 %683, %v369_v25  }
  0x5b   :  { %160 = vmatmul.f32.gmra.mxu0 %v98_v30  ;;  %187 = vmatmul.f32.gmra.mxu3 %v107_v31  ;;  %v390_v30 = vperm.slane %v902_v57, 3 }
  0x5d   :  { %423 = vperm.xlu0 %681, %v418_v11  }
  0x5e   :  { %395 = vperm.xlu2 %683, %v390_v30  }
  0x63   :  { %163 = vmatmul.f32.gmra.mxu0 %v99_v36  ;;  %190 = vmatmul.f32.gmra.mxu3 %v108_v37  ;;  %v411_v37 = vperm.slane %v902_v57, 6  ;;  %v551_v57 = vld [vmem:[#allocation8 + $0x70] sm:$0xff] }
  0x64   :  { %597 = vmatpush.msrb.mxu2 %v551_v57 }
  0x66   :  { %416 = vperm.xlu2 %683, %v411_v37   ;;  %598 = vmatpush.msrb.mxu2 %v550_v61 }
  0x6b   :  { %166 = vmatmul.f32.gmra.mxu0 %v100_v42 }
  0x73   :  { %169 = vmatmul.f32.gmra.mxu0 %v101_v44 }
  0xa7   :  { %v319_v59 = vpop.permute.xlu0 %318  ;;  %v333_v2 = vpop.permute.xlu1 %332 }
  0xb0   :  { %v146_v58 = vpop.f32.mrf.mxu0 }
  0xb1   :  { %v147_v60 = vadd.f32 %v897_v56, %v146_v58 }
  0xb3   :  { %v194_v62 = vmax.f32 %v147_v60, 0.0 }
  0xb5   :  { %246 = vmatmul.f32.vlgmr.msra.gmra.mxu1 %v194_v62  ;;  %v549_v62 = vld [vmem:[#allocation8 + $0x60] sm:$0xff] }
  0xb6   :  { %v173_v63 = vpop.f32.mrf.mxu3  ;;  %599 = vmatpush.msrb.mxu2 %v549_v62 }
  0xb7   :  { %v174_v0 = vadd.f32 %v897_v56, %v173_v63 }
  0xb8   :  { %v149_v1 = vpop.f32.mrf.mxu0 }
  0xb9   :  { %v203_v3 = vmax.f32 %v174_v0, 0.0  ;;  %v150_v4 = vadd.f32 %v897_v56, %v149_v1  ;;  %v347_v0 = vpop.permute.xlu2 %346  ;;  %v548_v1 = vld [vmem:[#allocation8 + $0x58] sm:$0xff] }
  0xba   :  { %600 = vmatpush.msrb.mxu2 %v548_v1 }
  0xbb   :  { %v195_v6 = vmax.f32 %v150_v4, 0.0  ;;  %273 = vmatmul.f32.vlgmr.msra.gmra.mxu2 %v203_v3  ;;  %v547_v3 = vld [vmem:[#allocation8 + $0x50] sm:$0xff] }
  0xbc   :  { %601 = vmatpush.msrb.mxu2 %v547_v3 }
  0xbd   :  { %249 = vmatmul.f32.gmra.mxu1 %v195_v6  ;;  %v326_v6 = vpop.permute.xlu0 %325 }
  0xbe   :  { %v176_v7 = vpop.f32.mrf.mxu3 }
  0xbf   :  { %v177_v8 = vadd.f32 %v897_v56, %v176_v7  ;;  %v546_v7 = vld [vmem:[#allocation8 + $0x48] sm:$0xff] }
  0xc0   :  { %v152_v10 = vpop.f32.mrf.mxu0  ;;  %602 = vmatpush.msrb.mxu2 %v546_v7 }
  0xc1   :  { %v204_v12 = vmax.f32 %v177_v8, 0.0  ;;  %v153_v13 = vadd.f32 %v897_v56, %v152_v10 }
  0xc2   :  { %603 = vmatpush.msrb.mxu2 %v545_v9 }
  0xc3   :  { %v196_v14 = vmax.f32 %v153_v13, 0.0  ;;  %276 = vmatmul.f32.gmra.mxu2 %v204_v12  ;;  %v544_v12 = vld [vmem:[#allocation8 + $0x38] sm:$0xff] }
  0xc4   :  { %604 = vmatpush.msrb.mxu2 %v544_v12 }
  0xc5   :  { %252 = vmatmul.f32.gmra.mxu1 %v196_v14  ;;  %v354_v14 = vpop.permute.xlu2 %353 }
  0xc6   :  { %v179_v15 = vpop.f32.mrf.mxu3 }
  0xc7   :  { %v180_v17 = vadd.f32 %v897_v56, %v179_v15  ;;  %v543_v15 = vld [vmem:[#allocation8 + $0x30] sm:$0xff] }
  0xc8   :  { %v155_v19 = vpop.f32.mrf.mxu0  ;;  %605 = vmatpush.msrb.mxu2 %v543_v15 }
  0xc9   :  { %v205_v20 = vmax.f32 %v180_v17, 0.0  ;;  %v156_v21 = vadd.f32 %v897_v56, %v155_v19  ;;  %v340_v17 = vpop.permute.xlu1 %339 }
  0xcb   :  { %v197_v22 = vmax.f32 %v156_v21, 0.0  ;;  %279 = vmatmul.f32.gmra.mxu2 %v205_v20  ;;  %v542_v20 = vld [vmem:[#allocation8 + $0x28] sm:$0xff] }
  0xcc   :  { %606 = vmatpush.msrb.mxu2 %v542_v20 }
  0xcd   :  { %255 = vmatmul.f32.gmra.mxu1 %v197_v22  ;;  %v361_v22 = vpop.permute.xlu0 %360 }
  0xce   :  { %v182_v23 = vpop.f32.mrf.mxu3 }
  0xcf   :  { %v183_v24 = vadd.f32 %v897_v56, %v182_v23 }
  0xd0   :  { %v158_v26 = vpop.f32.mrf.mxu0 }
  0xd1   :  { %v206_v27 = vmax.f32 %v183_v24, 0.0  ;;  %v159_v28 = vadd.f32 %v897_v56, %v158_v26  ;;  %v541_v24 = vld [vmem:[#allocation8 + $0x20] sm:$0xff] }
  0xd2   :  { %607 = vmatpush.msrb.mxu2 %v541_v24 }
  0xd3   :  { %v198_v29 = vmax.f32 %v159_v28, 0.0  ;;  %282 = vmatmul.f32.gmra.mxu2 %v206_v27 }
  0xd5   :  { %258 = vmatmul.f32.gmra.mxu1 %v198_v29  ;;  %v540_v29 = vld [vmem:[#allocation8 + $0x18] sm:$0xff] }
  0xd6   :  { %v185_v31 = vpop.f32.mrf.mxu3  ;;  %608 = vmatpush.msrb.mxu2 %v540_v29 }
  0xd7   :  { %v186_v32 = vadd.f32 %v897_v56, %v185_v31 }
  0xd8   :  { %v161_v33 = vpop.f32.mrf.mxu0 }
  0xd9   :  { %v207_v34 = vmax.f32 %v186_v32, 0.0  ;;  %v162_v35 = vadd.f32 %v897_v56, %v161_v33  ;;  %v539_v33 = vld [vmem:[#allocation8 + $0x10] sm:$0xff] }
  0xda   :  { %609 = vmatpush.msrb.mxu2 %v539_v33 }
  0xdb   :  { %v199_v36 = vmax.f32 %v162_v35, 0.0  ;;  %285 = vmatmul.f32.gmra.mxu2 %v207_v34 }
  0xdd   :  { %261 = vmatmul.f32.gmra.mxu1 %v199_v36 }
  0xde   :  { %v188_v38 = vpop.f32.mrf.mxu3 }
  0xdf   :  { %v189_v39 = vadd.f32 %v897_v56, %v188_v38  ;;  %v941_v38 = vpop.permute.xlu2 %374 }
  0xe0   :  { %v164_v40 = vpop.f32.mrf.mxu0 }
  0xe1   :  { %v208_v41 = vmax.f32 %v189_v39, 0.0  ;;  %v165_v42 = vadd.f32 %v897_v56, %v164_v40  ;;  %v538_v39 = vld [vmem:[#allocation8 + $0x8] sm:$0xff] }
  0xe2   :  { %610 = vmatpush.msrb.mxu2 %v538_v39 }
  0xe3   :  { %v200_v43 = vmax.f32 %v165_v42, 0.0  ;;  %288 = vmatmul.f32.gmra.mxu2 %v208_v41  ;;  %v943_v41 = vpop.permute.xlu1 %367 }
  0xe5   :  { %264 = vmatmul.f32.gmra.mxu1 %v200_v43 }
  0xe6   :  { %v191_v44 = vpop.f32.mrf.mxu3 }
  0xe7   :  { %v192_v45 = vadd.f32 %v897_v56, %v191_v44 }
  0xe8   :  { %v167_v46 = vpop.f32.mrf.mxu0 }
  0xe9   :  { %v209_v47 = vmax.f32 %v192_v45, 0.0  ;;  %v168_v48 = vadd.f32 %v897_v56, %v167_v46  ;;  %v537_v45 = vld [vmem:[#allocation8] sm:$0xff] }
  0xea   :  { %611 = vmatpush.msrb.mxu2 %v537_v45 }
  0xeb   :  { %v201_v49 = vmax.f32 %v168_v48, 0.0  ;;  %291 = vmatmul.f32.gmra.mxu2 %v209_v47 }
  0xed   :  { %267 = vmatmul.f32.gmra.mxu1 %v201_v49 }
  0xf0   :  { %v170_v50 = vpop.f32.mrf.mxu0 }
  0xf1   :  { %v171_v51 = vadd.f32 %v897_v56, %v170_v50  ;;  %v933_v56 = vld [vmem:[%s990_s5] ss:$0 sm:$0xff] }
  0xf3   :  { %v202_v52 = vmax.f32 %v171_v51, 0.0  ;;  %v382_v51 = vpop.permute.xlu0 %381 }
  0xf5   :  { %270 = vmatmul.f32.gmra.mxu1 %v202_v52 }
 0x132   :  { %v247_v53 = vpop.f32.mrf.mxu1 }
 0x133   :  { %v248_v8 = vadd.f32 %v933_v56, %v247_v53 }
 0x135   :  { %v295_v13 = vmax.f32 %v248_v8, 0.0 }
 0x137   :  { %v425_v21 = vmul.f32 %v319_v59, %v295_v13 }
 0x139   :  { %v441_v30 = vrot.slane %v425_v21, 4 }
 0x13a   :  { %v250_v54 = vpop.f32.mrf.mxu1 }
 0x13b   :  { %v251_v4 = vadd.f32 %v933_v56, %v250_v54  ;;  %v442_v40 = vadd.f32 %v441_v30, %v425_v21  ;;  %v403_v21 = vpop.permute.xlu0 %402 }
 0x13d   :  { %v296_v10 = vmax.f32 %v251_v4, 0.0  ;;  %v443_v52 = vrot.slane %v442_v40, 2 }
 0x13e   :  { %v274_v58 = vpop.f32.mrf.mxu2 }
 0x13f   :  { %v426_v16 = vmul.f32 %v326_v6, %v296_v10  ;;  %v275_v31 = vadd.f32 %v933_v56, %v274_v58  ;;  %v396_v6 = vpop.permute.xlu2 %395  ;;  %v389_v10 = vpop.permute.xlu1 %388 }
 0x141   :  { %v447_v25 = vrot.slane %v426_v16, 4  ;;  %v304_v43 = vmax.f32 %v275_v31, 0.0 }
 0x142   :  { %v253_v60 = vpop.f32.mrf.mxu1 }
 0x143   :  { %v254_v18 = vadd.f32 %v933_v56, %v253_v60  ;;  %v448_v34 = vadd.f32 %v447_v25, %v426_v16  ;;  %v434_v54 = vmul.f32 %v382_v51, %v304_v43 }
 0x145   :  { %v297_v26 = vmax.f32 %v254_v18, 0.0  ;;  %v449_v46 = vrot.slane %v448_v34, 2  ;;  %v495_v3 = vrot.slane %v434_v54, 4 }
 0x146   :  { %v928_v63 = vpop.f32.mrf.mxu2 }
 0x147   :  { %v427_v35 = vmul.f32 %v333_v2, %v297_v26  ;;  %v278_v55 = vadd.f32 %v933_v56, %v928_v63  ;;  %v450_v58 = vadd.f32 %v449_v46, %v448_v34  ;;  %v444_v2 = vadd.f32 %v443_v52, %v442_v40  ;;  %v410_v46 = vpop.permute.xlu1 %409 }
 0x149   :  { %v453_v47 = vrot.slane %v427_v35, 4  ;;  %v305_v4 = vmax.f32 %v278_v55, 0.0  ;;  %v451_v8 = vrot.slane %v450_v58, 1 }
 0x14a   :  { %v256_v5 = vpop.f32.mrf.mxu1 }
 0x14b   :  { %v257_v23 = vadd.f32 %v933_v56, %v256_v5  ;;  %v454_v59 = vadd.f32 %v453_v47, %v427_v35  ;;  %v452_v25 = vadd.f32 %v451_v8, %v450_v58 }
 0x14d   :  { %v298_v32 = vmax.f32 %v257_v23, 0.0  ;;  %v455_v9 = vrot.slane %v454_v59, 2  ;;  %v435_v23 = vmul.f32 %v389_v10, %v305_v4 }
 0x14e   :  { %v280_v11 = vpop.f32.mrf.mxu2 }
 0x14f   :  { %v428_v44 = vmul.f32 %v340_v17, %v298_v32  ;;  %v445_v17 = vrot.slane %v444_v2, 1  ;;  %v456_v26 = vadd.f32 %v455_v9, %v454_v59 }
 0x151   :  { %v459_v57 = vrot.slane %v428_v44, 4  ;;  %v446_v33 = vadd.f32 %v445_v17, %v444_v2 }
 0x152   :  { %v259_v19 = vpop.f32.mrf.mxu1 }
 0x153   :  { %v260_v27 = vadd.f32 %v933_v56, %v259_v19  ;;  %v460_v5 = vadd.f32 %v459_v57, %v428_v44  ;;  %v953_v19 = vadd.f32 %v495_v3, %v434_v54  ;;  %v424_v3 = vpop.permute.xlu0 %423 }
 0x155   :  { %v299_v36 = vmax.f32 %v260_v27, 0.0  ;;  %v461_v20 = vrot.slane %v460_v5, 2  ;;  %v497_v43 = vrot.slane %v953_v19, 2 }
 0x156   :  { %v283_v28 = vpop.f32.mrf.mxu2 }
 0x157   :  { %v429_v48 = vmul.f32 %v347_v0, %v299_v36  ;;  %v281_v0 = vadd.f32 %v933_v56, %v280_v11  ;;  %v284_v12 = vadd.f32 %v933_v56, %v283_v28  ;;  %v462_v36 = vadd.f32 %v461_v20, %v460_v5 }
 0x159   :  { %v465_v60 = vrot.slane %v429_v48, 4  ;;  %v306_v18 = vmax.f32 %v281_v0, 0.0  ;;  %v307_v28 = vmax.f32 %v284_v12, 0.0  ;;  %v463_v58 = vrot.slane %v462_v36, 1 }
 0x15a   :  { %v262_v37 = vpop.f32.mrf.mxu1 }
 0x15b   :  { %v263_v42 = vadd.f32 %v933_v56, %v262_v37  ;;  %v466_v63 = vadd.f32 %v465_v60, %v429_v48  ;;  %v436_v34 = vmul.f32 %v396_v6, %v306_v18  ;;  %v501_v37 = vrot.slane %v435_v23, 4 }
 0x15c   :  { %v437_v45 = vmul.f32 %v403_v21, %v307_v28  ;;  %v574_v48 = vsel %vm573_vm0, %v452_v25, %v446_v33 }
 0x15d   :  { %v300_v49 = vmax.f32 %v263_v42, 0.0  ;;  %v467_v27 = vrot.slane %v466_v63, 2  ;;  %v457_v42 = vrot.slane %v456_v26, 1  ;;  %v502_v59 = vadd.f32 %v501_v37, %v435_v23 }
 0x15e   :  { %v286_v50 = vpop.f32.mrf.mxu2 }
 0x15f   :  { %v430_v53 = vmul.f32 %v354_v14, %v300_v49  ;;  %v287_v15 = vadd.f32 %v933_v56, %v286_v50  ;;  %v468_v44 = vadd.f32 %v467_v27, %v466_v63  ;;  %v417_v50 = vpop.permute.xlu2 %416  ;;  %v464_v63 = vadd.f32 %v463_v58, %v462_v36 }
 0x160   :  { %v503_v12 = vrot.slane %v502_v59, 2 }
 0x161   :  { %v471_v62 = vrot.slane %v430_v53, 4  ;;  %v308_v31 = vmax.f32 %v287_v15, 0.0 }
 0x162   :  { %v265_v61 = vpop.f32.mrf.mxu1 }
 0x163   :  { %v266_v1 = vadd.f32 %v933_v56, %v265_v61  ;;  %v472_v14 = vadd.f32 %v471_v62, %v430_v53  ;;  %v438_v51 = vmul.f32 %v410_v46, %v308_v31  ;;  %v507_v53 = vrot.slane %v436_v34, 4 }
 0x164   :  { %v458_v61 = vadd.f32 %v457_v42, %v456_v26  ;;  %v469_v62 = vrot.slane %v468_v44, 1 }
 0x165   :  { %v301_v7 = vmax.f32 %v266_v1, 0.0  ;;  %v473_v30 = vrot.slane %v472_v14, 2  ;;  %v513_v1 = vrot.slane %v437_v45, 4  ;;  %v519_v5 = vrot.slane %v438_v51, 4 }
 0x166   :  { %v289_v13 = vpop.f32.mrf.mxu2  ;;  %v470_v15 = vadd.f32 %v469_v62, %v468_v44  ;;  %v576_v18 = vsel %vm575_vm1, %v458_v61, %v574_v48 }
 0x167   :  { %v431_v16 = vmul.f32 %v361_v22, %v301_v7  ;;  %v290_v11 = vadd.f32 %v933_v56, %v289_v13  ;;  %v474_v49 = vadd.f32 %v473_v30, %v472_v14  ;;  %v508_v7 = vadd.f32 %v507_v53, %v436_v34 }
 0x168   :  { %v520_v20 = vadd.f32 %v519_v5, %v438_v51  ;;  %v498_v30 = vadd.f32 %v497_v43, %v953_v19 }
 0x169   :  { %v477_v24 = vrot.slane %v431_v16, 4  ;;  %v309_v35 = vmax.f32 %v290_v11, 0.0  ;;  %v475_v4 = vrot.slane %v474_v49, 1 }
 0x16a   :  { %v268_v29 = vpop.f32.mrf.mxu1  ;;  %v499_v19 = vrot.slane %v498_v30, 1 }
 0x16b   :  { %v478_v32 = vadd.f32 %v477_v24, %v431_v16  ;;  %v269_v22 = vadd.f32 %v933_v56, %v268_v29  ;;  %v439_v55 = vmul.f32 %v417_v50, %v309_v35  ;;  %v514_v16 = vadd.f32 %v513_v1, %v437_v45 }
 0x16c   :  { %v476_v11 = vadd.f32 %v475_v4, %v474_v49  ;;  %v509_v24 = vrot.slane %v508_v7, 2  ;;  %v578_v29 = vsel %vm577_vm2, %v464_v63, %v576_v18  ;;  %v504_v35 = vadd.f32 %v503_v12, %v502_v59 }
 0x16d   :  { %v479_v39 = vrot.slane %v478_v32, 2  ;;  %v302_v40 = vmax.f32 %v269_v22, 0.0  ;;  %v525_v9 = vrot.slane %v439_v55, 4  ;;  %v515_v31 = vrot.slane %v514_v16, 2 }
 0x16e   :  { %v292_v47 = vpop.f32.mrf.mxu2  ;;  %v521_v22 = vrot.slane %v520_v20, 2  ;;  %v500_v53 = vadd.f32 %v499_v19, %v498_v30 }
 0x16f   :  { %v432_v52 = vmul.f32 %v943_v41, %v302_v40  ;;  %v480_v54 = vadd.f32 %v479_v39, %v478_v32  ;;  %v293_v57 = vadd.f32 %v933_v56, %v292_v47  ;;  %v580_v32 = vsel %vm579_vm3, %v470_v15, %v578_v29 }
 0x170   :  { %v510_v39 = vadd.f32 %v509_v24, %v508_v7  ;;  %v516_v45 = vadd.f32 %v515_v31, %v514_v16  ;;  %v522_v43 = vadd.f32 %v521_v22, %v520_v20  ;;  %v505_v47 = vrot.slane %v504_v35, 1 }
 0x171   :  { %v483_v60 = vrot.slane %v432_v52, 4  ;;  %v310_v2 = vmax.f32 %v293_v57, 0.0  ;;  %v481_v8 = vrot.slane %v480_v54, 1 }
 0x172   :  { %v271_v0 = vpop.f32.mrf.mxu1  ;;  %v511_v49 = vrot.slane %v510_v39, 1  ;;  %v506_v57 = vadd.f32 %v505_v47, %v504_v35 }
 0x173   :  { %v484_v6 = vadd.f32 %v483_v60, %v432_v52  ;;  %v272_v41 = vadd.f32 %v933_v56, %v271_v0  ;;  %v440_v10 = vmul.f32 %v424_v3, %v310_v2  ;;  %v526_v56 = vadd.f32 %v525_v9, %v439_v55 }
 0x174   :  { %v482_v25 = vadd.f32 %v481_v8, %v480_v54  ;;  %v517_v52 = vrot.slane %v516_v45, 1  ;;  %v523_v54 = vrot.slane %v522_v43, 1  ;;  %v512_v59 = vadd.f32 %v511_v49, %v510_v39  ;;  %v686_v8 = vld [vmem:[%s992_s7] ss:$0 sm:$0xff] }
 0x175   :  { %v485_v13 = vrot.slane %v484_v6, 2  ;;  %v303_v14 = vmax.f32 %v272_v41, 0.0  ;;  %v531_v17 = vrot.slane %v440_v10, 4  ;;  %v527_v36 = vrot.slane %v526_v56, 2 }
 0x176   :  { %v518_v62 = vadd.f32 %v517_v52, %v516_v45  ;;  %v524_v2 = vadd.f32 %v523_v54, %v522_v43 }
 0x177   :  { %v486_v21 = vadd.f32 %v485_v13, %v484_v6  ;;  %v433_v23 = vmul.f32 %v941_v38, %v303_v14  ;;  %v532_v26 = vadd.f32 %v531_v17, %v440_v10  ;;  %v582_v38 = vsel %vm581_vm4, %v476_v11, %v580_v32 }
 0x178   :  { %v584_v37 = vsel %vm583_vm5, %v482_v25, %v582_v38  ;;  %v528_v48 = vadd.f32 %v527_v36, %v526_v56 }
 0x179   :  { %v489_v27 = vrot.slane %v433_v23, 4  ;;  %v487_v28 = vrot.slane %v486_v21, 1  ;;  %v533_v40 = vrot.slane %v532_v26, 2 }
 0x17a   :  { %v529_v58 = vrot.slane %v528_v48, 1 }
 0x17b   :  { %v490_v33 = vadd.f32 %v489_v27, %v433_v23  ;;  %v488_v34 = vadd.f32 %v487_v28, %v486_v21  ;;  %v534_v51 = vadd.f32 %v533_v40, %v532_v26 }
 0x17c   :  { %v530_v3 = vadd.f32 %v529_v58, %v528_v48 }
 0x17d   :  { %v491_v42 = vrot.slane %v490_v33, 2  ;;  %v586_v44 = vsel %vm585_vm6, %v488_v34, %v584_v37  ;;  %v535_v61 = vrot.slane %v534_v51, 1 }
 0x17e   :  { %612 = vmatmul.f32.vlgmr.msrb.gmra.mxu2 %v586_v44 }
 0x17f   :  { %v492_v46 = vadd.f32 %v491_v42, %v490_v33  ;;  %v536_v5 = vadd.f32 %v535_v61, %v534_v51 }
 0x181   :  { %v493_v50 = vrot.slane %v492_v46, 1 }
 0x183   :  { %v494_v55 = vadd.f32 %v493_v50, %v492_v46 }
 0x185   :  { %v587_v60 = vsel %vm573_vm0, %v500_v53, %v494_v55 }
 0x186   :  { %v588_v1 = vsel %vm575_vm1, %v506_v57, %v587_v60 }
 0x187   :  { %v589_v0 = vsel %vm577_vm2, %v512_v59, %v588_v1 }
 0x188   :  { %v590_v4 = vsel %vm579_vm3, %v518_v62, %v589_v0 }
 0x189   :  { %v591_v6 = vsel %vm581_vm4, %v524_v2, %v590_v4 }
 0x18a   :  { %v592_v41 = vsel %vm583_vm5, %v530_v3, %v591_v6 }
 0x18b   :  { %v593_v7 = vsel %vm585_vm6, %v536_v5, %v592_v41 }
 0x18c   :  { %615 = vmatmul.f32.gmra.mxu2 %v593_v7 }
 0x201   :  { %v613_v9 = vpop.f32.mrf.mxu2 }
 0x202   :  { %v614_v10 = vadd.f32 %v686_v8, %v613_v9 }
 0x204   :  { %619 = vst [vmem:[#allocation10] sm:$0xff] %v614_v10 }
 0x20f   :  { %v616_v63 = vpop.f32.mrf.mxu2 }
 0x210   :  { %v617_v12 = vadd.f32 %v686_v8, %v616_v63 }
 0x212   :  { %620 = vst [vmem:[#allocation10 + $0x8] sm:$0xff] %v617_v12 }
 0x213   :  { %633 = dma.vmem_to_hbm [thread:$0]  %s626_s9, 256, %s628_s12, [#allocation4], %s816_s13, %s816_s13, %s817_s14  }
 0x214   :  { %813 = dma.done.wait [#allocation4], 256  }
 0x215   :  { %814 = vsyncadd [#allocation4], 4294967040 }
 0x216   :  { %638 = vsyncpa [#allocation3], 1 }
 0x217   :  { %639 = vsyncpa [#allocation6], 1 }
 0x218   :  { %640 = vsyncpa [#allocation9], 1 }
 0x219   :  { %641 = vsyncpa [#allocation4], 1 }

</bundles_post_ra>
